<compile_context>
chip_gen: v7x
topology: tpu7x:2x2x1
jax: 0.10.0
libtpu: 0.0.40
codegen_flags: <defaults>
</compile_context>

<pallas_src>
import math
import functools

import jax
import jax.numpy as jnp
from jax import lax
from jax.experimental import pallas as pl
from jax.experimental.pallas import tpu as pltpu

LN_EPS = 1e-5


# ---------------------------------------------------------------------------
# Helpers
# ---------------------------------------------------------------------------
def _layer_norm(x, w, b):
    mu = jnp.mean(x, axis=-1, keepdims=True)
    var = jnp.mean((x - mu) ** 2, axis=-1, keepdims=True)
    return (x - mu) * lax.rsqrt(var + LN_EPS) * w + b


def _pick_vmem_limit():
    """~3/4 of physical VMEM: ~96 MiB on v5e/v6e (128 MiB), ~48 MiB on v7x (64 MiB)."""
    try:
        cap = pltpu.get_tpu_info().vmem_capacity_bytes
        return int(cap * 3 // 4)
    except Exception:
        return 48 * 1024 * 1024


def _pick_tile(total, candidates):
    for c in candidates:
        if c <= total and total % c == 0:
            return c
    return total


# ---------------------------------------------------------------------------
# Kernel 1: fused encoder stack (grid = (batch_blocks, num_layers))
# ---------------------------------------------------------------------------
def _encoder_kernel(
        x0_ref,
        wqkv_ref, bqkv_ref, wo_ref, bo_ref, ln1w_ref, ln1b_ref,
        w1_ref, b1_ref, w2_ref, b2_ref, ln2w_ref, ln2b_ref,
        enc_ref,
        x_sc, q_sc, k_sc, v_sc, o_sc,
        *, nhead):
    """One grid step = (one batch block, one encoder layer).

    Activations persist in `x_sc` across the 'arbitrary' layer axis; the final
    layer writes the encoded activations to `enc_ref`.
    """
    l = pl.program_id(1)
    num_layers = pl.num_programs(1)

    BB, S, D = x0_ref.shape
    H = nhead
    Dh = D // H
    R = BB * S
    bf16, f32 = jnp.bfloat16, jnp.float32

    # ---- layer 0: load (embed*sqrt(D) + PE) block into the resident scratch ----
    @pl.when(l == 0)
    def _():
        x_sc[...] = x0_ref[...].reshape(R, D)

    x = x_sc[...]                                              # (R, D) f32

    # ---- self-attention ------------------------------------------------------
    # Fused lane-dense QKV projection: single (R, D) @ (D, 3D) matmul, K=D, N=3D.
    qkv = jnp.dot(x.astype(bf16), wqkv_ref[0],
                  preferred_element_type=f32) + bqkv_ref[0]    # (R, 3D) f32

    # Scatter into head-major (BB*H, S, Dh) scratches (data movement only; the
    # matmuls below are single head-batched dot_generals, not per-head calls).
    for b in range(BB):
        rows = qkv[b * S:(b + 1) * S, :]                       # (S, 3D)
        for h in range(H):
            i = b * H + h
            q_sc[i] = rows[:, h * Dh:(h + 1) * Dh].astype(bf16)
            k_sc[i] = rows[:, D + h * Dh:D + (h + 1) * Dh].astype(bf16)
            v_sc[i] = rows[:, 2 * D + h * Dh:2 * D + (h + 1) * Dh].astype(bf16)

    q3 = q_sc[...]                                             # (BB*H, S, Dh) bf16
    k3 = k_sc[...]
    v3 = v_sc[...]

    s = lax.dot_general(q3, k3, (((2,), (2,)), ((0,), (0,))),
                        preferred_element_type=f32) * (1.0 / math.sqrt(Dh))
    s = s - jnp.max(s, axis=-1, keepdims=True)
    p = jnp.exp(s)
    p = p * pl.reciprocal(jnp.sum(p, axis=-1, keepdims=True), approx=True)
    o3 = lax.dot_general(p.astype(bf16), v3, (((2,), (1,)), ((0,), (0,))),
                         preferred_element_type=f32)           # (BB*H, S, Dh)

    # Reassemble concat(heads) into (R, D) (data movement), then ONE K=D projection.
    for b in range(BB):
        for h in range(H):
            o_sc[b * S:(b + 1) * S, h * Dh:(h + 1) * Dh] = o3[b * H + h].astype(bf16)

    attn = jnp.dot(o_sc[...], wo_ref[0],
                   preferred_element_type=f32) + bo_ref[0]     # (R, D) f32

    # ---- post-norm residual + FFN (PyTorch defaults: norm_first=False, relu) ---
    x1 = _layer_norm(x + attn, ln1w_ref[0], ln1b_ref[0])

    h1 = jnp.dot(x1.astype(bf16), w1_ref[0], preferred_element_type=f32) + b1_ref[0]
    h1 = jnp.maximum(h1, 0.0)
    h2 = jnp.dot(h1.astype(bf16), w2_ref[0], preferred_element_type=f32) + b2_ref[0]

    x2 = _layer_norm(x1 + h2, ln2w_ref[0], ln2b_ref[0])
    x_sc[...] = x2

    @pl.when(l == num_layers - 1)
    def _():
        enc_ref[...] = x2.reshape(BB, S, D)


# ---------------------------------------------------------------------------
# Kernel 2: vocab projection, tiled over (rows, 128-padded vocab)
# ---------------------------------------------------------------------------
def _vocab_proj_kernel(x_ref, w_ref, b_ref, out_ref):
    out_ref[...] = (jnp.dot(x_ref[...].astype(jnp.bfloat16), w_ref[...],
                            preferred_element_type=jnp.float32)
                    + b_ref[...]).astype(out_ref.dtype)


# ---------------------------------------------------------------------------
# pallas_call wrapper
# ---------------------------------------------------------------------------
def transformer_forward(kp, src, *, batch_block=None):
    # src: (B, S) int32 token ids
    B, S = src.shape
    max_len = kp["max_len"]
    if S > max_len:
        src = src[:, :max_len]
        S = max_len

    D = kp["embed_size"]
    H = kp["nhead"]
    L = kp["num_layers"]
    V = kp["vocab_size"]
    Vp = kp["fc_w"].shape[1]
    F = kp["w1"].shape[2]

    # Large batch blocks minimize per-layer weight re-streaming (review #3).
    # TODO(synk): for large B/S, size BB against the per-generation VMEM budget.
    BB = B if batch_block is None else batch_block
    assert B % BB == 0
    gb = B // BB

    # Embedding gather + scale + positional encoding as plain-JAX glue (review #10).
    x0 = (jnp.take(kp["embedding"], src, axis=0) * math.sqrt(D)
          + kp["pe"][:, :S, :]).astype(jnp.float32)            # (B, S, D)

    vmem_limit = _pick_vmem_limit()

    def layer_spec(*rest):
        nz = len(rest)
        return pl.BlockSpec((1,) + rest, lambda b, l, _nz=nz: (l,) + (0,) * _nz)

    in_specs = [
        pl.BlockSpec((BB, S, D), lambda b, l: (b, 0, 0)),      # x0
        layer_spec(D, 3 * D),                                  # wqkv (bf16)
        layer_spec(1, 3 * D),                                  # bqkv
        layer_spec(D, D), layer_spec(1, D),                    # wo (bf16), bo
        layer_spec(1, D), layer_spec(1, D),                    # ln1w, ln1b
        layer_spec(D, F), layer_spec(1, F),                    # w1 (bf16), b1
        layer_spec(F, D), layer_spec(1, D),                    # w2 (bf16), b2
        layer_spec(1, D), layer_spec(1, D),                    # ln2w, ln2b
    ]
    out_spec = pl.BlockSpec((BB, S, D), lambda b, l: (b, 0, 0))

    enc = pl.pallas_call(
        functools.partial(_encoder_kernel, nhead=H),
        out_shape=jax.ShapeDtypeStruct((B, S, D), jnp.float32),
        grid=(gb, L),
        in_specs=in_specs,
        out_specs=out_spec,
        scratch_shapes=[
            pltpu.VMEM((BB * S, D), jnp.float32),              # x_sc (layer-resident)
            pltpu.VMEM((BB * H, S, D // H), jnp.bfloat16),     # q_sc
            pltpu.VMEM((BB * H, S, D // H), jnp.bfloat16),     # k_sc
            pltpu.VMEM((BB * H, S, D // H), jnp.bfloat16),     # v_sc
            pltpu.VMEM((BB * S, D), jnp.bfloat16),             # o_sc (concat heads)
        ],
        compiler_params=pltpu.CompilerParams(
            dimension_semantics=("parallel", "arbitrary"),
            vmem_limit_bytes=vmem_limit),
    )(x0, kp["wqkv"], kp["bqkv"], kp["wo"], kp["bo"],
      kp["ln1w"], kp["ln1b"], kp["w1"], kp["b1"],
      kp["w2"], kp["b2"], kp["ln2w"], kp["ln2b"])

    # ---- separate, vocab-tiled final projection (review #5) -------------------
    Rt = B * S
    enc_flat = enc.reshape(Rt, D)
    tm = _pick_tile(Rt, (512, 256, 128, 64, 32, 16, 8))
    tn = _pick_tile(Vp, (512, 256, 128))

    logits = pl.pallas_call(
        _vocab_proj_kernel,
        out_shape=jax.ShapeDtypeStruct((Rt, Vp), jnp.float32),
        grid=(Rt // tm, Vp // tn),
        in_specs=[pl.BlockSpec((tm, D), lambda i, j: (i, 0)),
                  pl.BlockSpec((D, tn), lambda i, j: (0, j)),
                  pl.BlockSpec((1, tn), lambda i, j: (0, j))],
        out_specs=pl.BlockSpec((tm, tn), lambda i, j: (i, j)),
        compiler_params=pltpu.CompilerParams(
            dimension_semantics=("parallel", "parallel"),
            vmem_limit_bytes=vmem_limit),
    )(enc_flat, kp["fc_w"], kp["fc_b"])

    return logits.reshape(B, S, Vp)[..., :V]                   # drop vocab padding


# ---------------------------------------------------------------------------
# Parameters
# ---------------------------------------------------------------------------
def make_positional_encoding(d_model, max_len):
    position = jnp.arange(max_len, dtype=jnp.float32)[:, None]
    div_term = jnp.exp(jnp.arange(0, d_model, 2, dtype=jnp.float32)
                       * (-math.log(10000.0) / d_model))
    pe = jnp.zeros((max_len, d_model), dtype=jnp.float32)
    pe = pe.at[:, 0::2].set(jnp.sin(position * div_term))
    pe = pe.at[:, 1::2].set(jnp.cos(position * div_term))
    return pe[None]                                            # (1, max_len, d_model)


def make_params(key, vocab_size, embed_size, nhead, num_layers, dim_ff, max_len):
    D, F = embed_size, dim_ff
    keys = jax.random.split(key, 3 + num_layers)

    def nrm(k, shape, std=0.02):
        return jax.random.normal(k, shape, dtype=jnp.float32) * std

    params = {
        "embedding": jax.random.normal(keys[0], (vocab_size, D), dtype=jnp.float32),
        "pe": make_positional_encoding(D, max_len),
        "fc_w": nrm(keys[1], (D, vocab_size)),
        "fc_b": nrm(keys[2], (vocab_size,)),
        "layers": [],
        "max_len": max_len, "nhead": nhead, "embed_size": embed_size,
        "vocab_size": vocab_size,
    }
    for i in range(num_layers):
        lk = jax.random.split(keys[3 + i], 12)
        params["layers"].append({
            "wq": nrm(lk[0], (D, D)), "bq": nrm(lk[1], (D,)),
            "wk": nrm(lk[2], (D, D)), "bk": nrm(lk[3], (D,)),
            "wv": nrm(lk[4], (D, D)), "bv": nrm(lk[5], (D,)),
            "wo": nrm(lk[6], (D, D)), "bo": nrm(lk[7], (D,)),
            "ln1w": jnp.ones((D,), jnp.float32), "ln1b": jnp.zeros((D,), jnp.float32),
            "w1": nrm(lk[8], (D, F)), "b1": nrm(lk[9], (F,)),
            "w2": nrm(lk[10], (F, D)), "b2": nrm(lk[11], (D,)),
            "ln2w": jnp.ones((D,), jnp.float32), "ln2b": jnp.zeros((D,), jnp.float32),
        })
    return params


def prepare_kernel_params(params):
    """Stack per-layer weights on a leading layer axis (fused QKV columns
    [Wq|Wk|Wv]), cast matmul weights to bf16, pad the vocab projection to 128."""
    D = params["embed_size"]
    H = params["nhead"]
    V = params["vocab_size"]
    bf16 = jnp.bfloat16

    wqkv, bqkv, wo, bo = [], [], [], []
    ln1w, ln1b, w1, b1, w2, b2, ln2w, ln2b = ([] for _ in range(8))
    for lp in params["layers"]:
        wqkv.append(jnp.concatenate([lp["wq"], lp["wk"], lp["wv"]], axis=1))   # (D, 3D)
        bqkv.append(jnp.concatenate([lp["bq"], lp["bk"], lp["bv"]])[None])     # (1, 3D)
        wo.append(lp["wo"]); bo.append(lp["bo"][None])
        ln1w.append(lp["ln1w"][None]); ln1b.append(lp["ln1b"][None])
        w1.append(lp["w1"]); b1.append(lp["b1"][None])
        w2.append(lp["w2"]); b2.append(lp["b2"][None])
        ln2w.append(lp["ln2w"][None]); ln2b.append(lp["ln2b"][None])

    Vp = ((V + 127) // 128) * 128                              # lane-dense vocab
    fc_w = jnp.zeros((D, Vp), jnp.float32).at[:, :V].set(params["fc_w"])
    fc_b = jnp.zeros((1, Vp), jnp.float32).at[:, :V].set(params["fc_b"][None])

    return {
        "embedding": params["embedding"], "pe": params["pe"],
        "wqkv": jnp.stack(wqkv).astype(bf16),                  # (L, D, 3D)
        "bqkv": jnp.stack(bqkv),                               # (L, 1, 3D)
        "wo": jnp.stack(wo).astype(bf16),                      # (L, D, D)
        "bo": jnp.stack(bo),                                   # (L, 1, D)
        "ln1w": jnp.stack(ln1w), "ln1b": jnp.stack(ln1b),
        "w1": jnp.stack(w1).astype(bf16), "b1": jnp.stack(b1),
        "w2": jnp.stack(w2).astype(bf16), "b2": jnp.stack(b2),
        "ln2w": jnp.stack(ln2w), "ln2b": jnp.stack(ln2b),
        "fc_w": fc_w.astype(bf16), "fc_b": fc_b,
        "max_len": params["max_len"], "nhead": H, "embed_size": D,
        "num_layers": len(params["layers"]), "vocab_size": V,
    }


# ---------------------------------------------------------------------------
# Pure-JAX reference (f32, same math) for validation
# ---------------------------------------------------------------------------
def reference_forward(params, src):
    B, S = src.shape
    D = params["embed_size"]; H = params["nhead"]; Dh = D // H
    x = jnp.take(params["embedding"], src, axis=0) * math.sqrt(D) + params["pe"][:, :S, :]

    def ln(z, w, b):
        mu = jnp.mean(z, -1, keepdims=True)
        var = jnp.mean((z - mu) ** 2, -1, keepdims=True)
        return (z - mu) * lax.rsqrt(var + LN_EPS) * w + b

    for lp in params["layers"]:
        q = x @ lp["wq"] + lp["bq"]
        k = x @ lp["wk"] + lp["bk"]
        v = x @ lp["wv"] + lp["bv"]
        q = q.reshape(B, S, H, Dh).transpose(0, 2, 1, 3)
        k = k.reshape(B, S, H, Dh).transpose(0, 2, 1, 3)
        v = v.reshape(B, S, H, Dh).transpose(0, 2, 1, 3)
        s = jnp.einsum("bhqd,bhkd->bhqk", q, k) / math.sqrt(Dh)
        p = jax.nn.softmax(s, axis=-1)
        o = jnp.einsum("bhqk,bhkd->bhqd", p, v).transpose(0, 2, 1, 3).reshape(B, S, D)
        o = o @ lp["wo"] + lp["bo"]
        x1 = ln(x + o, lp["ln1w"], lp["ln1b"])
        h = jnp.maximum(x1 @ lp["w1"] + lp["b1"], 0.0) @ lp["w2"] + lp["b2"]
        x = ln(x1 + h, lp["ln2w"], lp["ln2b"])
    return x @ params["fc_w"] + params["fc_b"]


# ---------------------------------------------------------------------------
if __name__ == "__main__":
    VOCAB, EMBED, NHEAD, LAYERS, FF, MAXLEN = 64, 32, 4, 2, 64, 64
    B, S = 2, 8

    key = jax.random.PRNGKey(0)
    pkey, dkey = jax.random.split(key)
    params = make_params(pkey, VOCAB, EMBED, NHEAD, LAYERS, FF, MAXLEN)
    kparams = prepare_kernel_params(params)
    src = jax.random.randint(dkey, (B, S), 0, VOCAB, dtype=jnp.int32)

    out = jax.block_until_ready(transformer_forward(kparams, src))
    assert out.shape == (B, S, VOCAB), out.shape

    ref = jax.block_until_ready(reference_forward(params, src))
    max_err = float(jnp.max(jnp.abs(out - ref)))
    assert jnp.allclose(out, ref, atol=2e-2, rtol=2e-2), max_err

    print("KERNEL_OK")
</pallas_src>

<mosaic_0001>
module attributes {stable_mosaic.version = 11 : i64} {
  func.func @_encoder_kernel(%arg0: i32, %arg1: i32, %arg2: memref<2x8x32xf32, #tpu.memory_space<vmem>>, %arg3: memref<1x32x96xbf16, #tpu.memory_space<vmem>>, %arg4: memref<1x1x96xf32, #tpu.memory_space<vmem>>, %arg5: memref<1x32x32xbf16, #tpu.memory_space<vmem>>, %arg6: memref<1x1x32xf32, #tpu.memory_space<vmem>>, %arg7: memref<1x1x32xf32, #tpu.memory_space<vmem>>, %arg8: memref<1x1x32xf32, #tpu.memory_space<vmem>>, %arg9: memref<1x32x64xbf16, #tpu.memory_space<vmem>>, %arg10: memref<1x1x64xf32, #tpu.memory_space<vmem>>, %arg11: memref<1x64x32xbf16, #tpu.memory_space<vmem>>, %arg12: memref<1x1x32xf32, #tpu.memory_space<vmem>>, %arg13: memref<1x1x32xf32, #tpu.memory_space<vmem>>, %arg14: memref<1x1x32xf32, #tpu.memory_space<vmem>>, %arg15: memref<2x8x32xf32, #tpu.memory_space<vmem>>, %arg16: memref<16x32xf32, #tpu.memory_space<vmem>>, %arg17: memref<8x8x8xbf16, #tpu.memory_space<vmem>>, %arg18: memref<8x8x8xbf16, #tpu.memory_space<vmem>>, %arg19: memref<8x8x8xbf16, #tpu.memory_space<vmem>>, %arg20: memref<16x32xbf16, #tpu.memory_space<vmem>>) attributes {dimension_semantics = [#tpu.dimension_semantics<parallel>, #tpu.dimension_semantics<arbitrary>], iteration_bounds = array<i64: 1, 2>, scalar_prefetch = 0 : i64, scratch_operands = 5 : i64, tpu.core_type = #tpu.core_type<tc>, window_params = [{transform_indices = @transform_0, window_bounds = array<i64: 2, 8, 32>}, {transform_indices = @transform_1, window_bounds = array<i64: 1, 32, 96>}, {transform_indices = @transform_2, window_bounds = array<i64: 1, 1, 96>}, {transform_indices = @transform_3, window_bounds = array<i64: 1, 32, 32>}, {transform_indices = @transform_4, window_bounds = array<i64: 1, 1, 32>}, {transform_indices = @transform_5, window_bounds = array<i64: 1, 1, 32>}, {transform_indices = @transform_6, window_bounds = array<i64: 1, 1, 32>}, {transform_indices = @transform_7, window_bounds = array<i64: 1, 32, 64>}, {transform_indices = @transform_8, window_bounds = array<i64: 1, 1, 64>}, {transform_indices = @transform_9, window_bounds = array<i64: 1, 64, 32>}, {transform_indices = @transform_10, window_bounds = array<i64: 1, 1, 32>}, {transform_indices = @transform_11, window_bounds = array<i64: 1, 1, 32>}, {transform_indices = @transform_12, window_bounds = array<i64: 1, 1, 32>}, {transform_indices = @transform_13, window_bounds = array<i64: 2, 8, 32>}]} {
    %c0_i32 = arith.constant 0 : i32
    %0 = arith.cmpi eq, %arg1, %c0_i32 : i32
    %1 = arith.extui %0 : i1 to i32
    %c0_i32_0 = arith.constant 0 : i32
    %2 = arith.cmpi ne, %1, %c0_i32_0 : i32
    scf.if %2 {
      %c0_149 = arith.constant 0 : index
      %c0_150 = arith.constant 0 : index
      %c0_151 = arith.constant 0 : index
      %268 = vector.load %arg2[%c0_149, %c0_150, %c0_151] : memref<2x8x32xf32, #tpu.memory_space<vmem>>, vector<2x8x32xf32>
      %269 = vector.shape_cast %268 : vector<2x8x32xf32> to vector<16x32xf32>
      %c0_152 = arith.constant 0 : index
      %c0_153 = arith.constant 0 : index
      %270 = vector.load %arg16[%c0_152, %c0_153] : memref<16x32xf32, #tpu.memory_space<vmem>>, vector<16x32xf32>
      tpu.vector_store %arg16[%c0_152, %c0_153], %269 {strides = array<i32>} : memref<16x32xf32, #tpu.memory_space<vmem>>, vector<16x32xf32>,
    } else {
    }
    %c0 = arith.constant 0 : index
    %c0_1 = arith.constant 0 : index
    %3 = vector.load %arg16[%c0, %c0_1] : memref<16x32xf32, #tpu.memory_space<vmem>>, vector<16x32xf32>
    %4 = arith.truncf %3 : vector<16x32xf32> to vector<16x32xbf16>
    %c0_2 = arith.constant 0 : index
    %c0_3 = arith.constant 0 : index
    %c0_4 = arith.constant 0 : index
    %5 = vector.load %arg3[%c0_2, %c0_3, %c0_4] : memref<1x32x96xbf16, #tpu.memory_space<vmem>>, vector<1x32x96xbf16>
    %6 = vector.shape_cast %5 : vector<1x32x96xbf16> to vector<32x96xbf16>
    %cst = arith.constant dense<0.000000e+00> : vector<16x96xf32>
    %7 = tpu.matmul %4, %6, %cst {dimension_numbers = #tpu.dot_dimension_numbers<[1], [0], [0], [1], [0, 0, 1, 1], [], []>} : vector<16x32xbf16>, vector<32x96xbf16>, vector<16x96xf32> -> vector<16x96xf32>
    %c0_5 = arith.constant 0 : index
    %c0_6 = arith.constant 0 : index
    %c0_7 = arith.constant 0 : index
    %8 = vector.load %arg4[%c0_5, %c0_6, %c0_7] : memref<1x1x96xf32, #tpu.memory_space<vmem>>, vector<1x1x96xf32>
    %9 = vector.shape_cast %8 : vector<1x1x96xf32> to vector<1x96xf32>
    %10 = vector.broadcast %9 : vector<1x96xf32> to vector<16x96xf32>
    %11 = arith.addf %7, %10 : vector<16x96xf32>
    %12 = vector.extract_strided_slice %11 {offsets = [0, 0], sizes = [8, 96], strides = [1, 1]} : vector<16x96xf32> to vector<8x96xf32>
    %13 = vector.extract_strided_slice %12 {offsets = [0, 0], sizes = [8, 8], strides = [1, 1]} : vector<8x96xf32> to vector<8x8xf32>
    %14 = arith.truncf %13 : vector<8x8xf32> to vector<8x8xbf16>
    %c0_8 = arith.constant 0 : index
    %c0_9 = arith.constant 0 : index
    %c0_10 = arith.constant 0 : index
    %15 = vector.load %arg17[%c0_8, %c0_9, %c0_10] : memref<8x8x8xbf16, #tpu.memory_space<vmem>>, vector<1x8x8xbf16>
    %16 = vector.shape_cast %15 : vector<1x8x8xbf16> to vector<8x8xbf16>
    %17 = vector.shape_cast %14 : vector<8x8xbf16> to vector<1x8x8xbf16>
    tpu.vector_store %arg17[%c0_8, %c0_9, %c0_10], %17 {strides = array<i32>} : memref<8x8x8xbf16, #tpu.memory_space<vmem>>, vector<1x8x8xbf16>,
    %18 = vector.extract_strided_slice %12 {offsets = [0, 32], sizes = [8, 8], strides = [1, 1]} : vector<8x96xf32> to vector<8x8xf32>
    %19 = arith.truncf %18 : vector<8x8xf32> to vector<8x8xbf16>
    %c0_11 = arith.constant 0 : index
    %c0_12 = arith.constant 0 : index
    %c0_13 = arith.constant 0 : index
    %20 = vector.load %arg18[%c0_11, %c0_12, %c0_13] : memref<8x8x8xbf16, #tpu.memory_space<vmem>>, vector<1x8x8xbf16>
    %21 = vector.shape_cast %20 : vector<1x8x8xbf16> to vector<8x8xbf16>
    %22 = vector.shape_cast %19 : vector<8x8xbf16> to vector<1x8x8xbf16>
    tpu.vector_store %arg18[%c0_11, %c0_12, %c0_13], %22 {strides = array<i32>} : memref<8x8x8xbf16, #tpu.memory_space<vmem>>, vector<1x8x8xbf16>,
    %23 = vector.extract_strided_slice %12 {offsets = [0, 64], sizes = [8, 8], strides = [1, 1]} : vector<8x96xf32> to vector<8x8xf32>
    %24 = arith.truncf %23 : vector<8x8xf32> to vector<8x8xbf16>
    %c0_14 = arith.constant 0 : index
    %c0_15 = arith.constant 0 : index
    %c0_16 = arith.constant 0 : index
    %25 = vector.load %arg19[%c0_14, %c0_15, %c0_16] : memref<8x8x8xbf16, #tpu.memory_space<vmem>>, vector<1x8x8xbf16>
    %26 = vector.shape_cast %25 : vector<1x8x8xbf16> to vector<8x8xbf16>
    %27 = vector.shape_cast %24 : vector<8x8xbf16> to vector<1x8x8xbf16>
    tpu.vector_store %arg19[%c0_14, %c0_15, %c0_16], %27 {strides = array<i32>} : memref<8x8x8xbf16, #tpu.memory_space<vmem>>, vector<1x8x8xbf16>,
    %28 = vector.extract_strided_slice %12 {offsets = [0, 8], sizes = [8, 8], strides = [1, 1]} : vector<8x96xf32> to vector<8x8xf32>
    %29 = arith.truncf %28 : vector<8x8xf32> to vector<8x8xbf16>
    %c1 = arith.constant 1 : index
    %c0_17 = arith.constant 0 : index
    %c0_18 = arith.constant 0 : index
    %30 = vector.load %arg17[%c1, %c0_17, %c0_18] : memref<8x8x8xbf16, #tpu.memory_space<vmem>>, vector<1x8x8xbf16>
    %31 = vector.shape_cast %30 : vector<1x8x8xbf16> to vector<8x8xbf16>
    %32 = vector.shape_cast %29 : vector<8x8xbf16> to vector<1x8x8xbf16>
    tpu.vector_store %arg17[%c1, %c0_17, %c0_18], %32 {strides = array<i32>} : memref<8x8x8xbf16, #tpu.memory_space<vmem>>, vector<1x8x8xbf16>,
    %33 = vector.extract_strided_slice %12 {offsets = [0, 40], sizes = [8, 8], strides = [1, 1]} : vector<8x96xf32> to vector<8x8xf32>
    %34 = arith.truncf %33 : vector<8x8xf32> to vector<8x8xbf16>
    %c1_19 = arith.constant 1 : index
    %c0_20 = arith.constant 0 : index
    %c0_21 = arith.constant 0 : index
    %35 = vector.load %arg18[%c1_19, %c0_20, %c0_21] : memref<8x8x8xbf16, #tpu.memory_space<vmem>>, vector<1x8x8xbf16>
    %36 = vector.shape_cast %35 : vector<1x8x8xbf16> to vector<8x8xbf16>
    %37 = vector.shape_cast %34 : vector<8x8xbf16> to vector<1x8x8xbf16>
    tpu.vector_store %arg18[%c1_19, %c0_20, %c0_21], %37 {strides = array<i32>} : memref<8x8x8xbf16, #tpu.memory_space<vmem>>, vector<1x8x8xbf16>,
    %38 = vector.extract_strided_slice %12 {offsets = [0, 72], sizes = [8, 8], strides = [1, 1]} : vector<8x96xf32> to vector<8x8xf32>
    %39 = arith.truncf %38 : vector<8x8xf32> to vector<8x8xbf16>
    %c1_22 = arith.constant 1 : index
    %c0_23 = arith.constant 0 : index
    %c0_24 = arith.constant 0 : index
    %40 = vector.load %arg19[%c1_22, %c0_23, %c0_24] : memref<8x8x8xbf16, #tpu.memory_space<vmem>>, vector<1x8x8xbf16>
    %41 = vector.shape_cast %40 : vector<1x8x8xbf16> to vector<8x8xbf16>
    %42 = vector.shape_cast %39 : vector<8x8xbf16> to vector<1x8x8xbf16>
    tpu.vector_store %arg19[%c1_22, %c0_23, %c0_24], %42 {strides = array<i32>} : memref<8x8x8xbf16, #tpu.memory_space<vmem>>, vector<1x8x8xbf16>,
    %43 = vector.extract_strided_slice %12 {offsets = [0, 16], sizes = [8, 8], strides = [1, 1]} : vector<8x96xf32> to vector<8x8xf32>
    %44 = arith.truncf %43 : vector<8x8xf32> to vector<8x8xbf16>
    %c2 = arith.constant 2 : index
    %c0_25 = arith.constant 0 : index
    %c0_26 = arith.constant 0 : index
    %45 = vector.load %arg17[%c2, %c0_25, %c0_26] : memref<8x8x8xbf16, #tpu.memory_space<vmem>>, vector<1x8x8xbf16>
    %46 = vector.shape_cast %45 : vector<1x8x8xbf16> to vector<8x8xbf16>
    %47 = vector.shape_cast %44 : vector<8x8xbf16> to vector<1x8x8xbf16>
    tpu.vector_store %arg17[%c2, %c0_25, %c0_26], %47 {strides = array<i32>} : memref<8x8x8xbf16, #tpu.memory_space<vmem>>, vector<1x8x8xbf16>,
    %48 = vector.extract_strided_slice %12 {offsets = [0, 48], sizes = [8, 8], strides = [1, 1]} : vector<8x96xf32> to vector<8x8xf32>
    %49 = arith.truncf %48 : vector<8x8xf32> to vector<8x8xbf16>
    %c2_27 = arith.constant 2 : index
    %c0_28 = arith.constant 0 : index
    %c0_29 = arith.constant 0 : index
    %50 = vector.load %arg18[%c2_27, %c0_28, %c0_29] : memref<8x8x8xbf16, #tpu.memory_space<vmem>>, vector<1x8x8xbf16>
    %51 = vector.shape_cast %50 : vector<1x8x8xbf16> to vector<8x8xbf16>
    %52 = vector.shape_cast %49 : vector<8x8xbf16> to vector<1x8x8xbf16>
    tpu.vector_store %arg18[%c2_27, %c0_28, %c0_29], %52 {strides = array<i32>} : memref<8x8x8xbf16, #tpu.memory_space<vmem>>, vector<1x8x8xbf16>,
    %53 = vector.extract_strided_slice %12 {offsets = [0, 80], sizes = [8, 8], strides = [1, 1]} : vector<8x96xf32> to vector<8x8xf32>
    %54 = arith.truncf %53 : vector<8x8xf32> to vector<8x8xbf16>
    %c2_30 = arith.constant 2 : index
    %c0_31 = arith.constant 0 : index
    %c0_32 = arith.constant 0 : index
    %55 = vector.load %arg19[%c2_30, %c0_31, %c0_32] : memref<8x8x8xbf16, #tpu.memory_space<vmem>>, vector<1x8x8xbf16>
    %56 = vector.shape_cast %55 : vector<1x8x8xbf16> to vector<8x8xbf16>
    %57 = vector.shape_cast %54 : vector<8x8xbf16> to vector<1x8x8xbf16>
    tpu.vector_store %arg19[%c2_30, %c0_31, %c0_32], %57 {strides = array<i32>} : memref<8x8x8xbf16, #tpu.memory_space<vmem>>, vector<1x8x8xbf16>,
    %58 = vector.extract_strided_slice %12 {offsets = [0, 24], sizes = [8, 8], strides = [1, 1]} : vector<8x96xf32> to vector<8x8xf32>
    %59 = arith.truncf %58 : vector<8x8xf32> to vector<8x8xbf16>
    %c3 = arith.constant 3 : index
    %c0_33 = arith.constant 0 : index
    %c0_34 = arith.constant 0 : index
    %60 = vector.load %arg17[%c3, %c0_33, %c0_34] : memref<8x8x8xbf16, #tpu.memory_space<vmem>>, vector<1x8x8xbf16>
    %61 = vector.shape_cast %60 : vector<1x8x8xbf16> to vector<8x8xbf16>
    %62 = vector.shape_cast %59 : vector<8x8xbf16> to vector<1x8x8xbf16>
    tpu.vector_store %arg17[%c3, %c0_33, %c0_34], %62 {strides = array<i32>} : memref<8x8x8xbf16, #tpu.memory_space<vmem>>, vector<1x8x8xbf16>,
    %63 = vector.extract_strided_slice %12 {offsets = [0, 56], sizes = [8, 8], strides = [1, 1]} : vector<8x96xf32> to vector<8x8xf32>
    %64 = arith.truncf %63 : vector<8x8xf32> to vector<8x8xbf16>
    %c3_35 = arith.constant 3 : index
    %c0_36 = arith.constant 0 : index
    %c0_37 = arith.constant 0 : index
    %65 = vector.load %arg18[%c3_35, %c0_36, %c0_37] : memref<8x8x8xbf16, #tpu.memory_space<vmem>>, vector<1x8x8xbf16>
    %66 = vector.shape_cast %65 : vector<1x8x8xbf16> to vector<8x8xbf16>
    %67 = vector.shape_cast %64 : vector<8x8xbf16> to vector<1x8x8xbf16>
    tpu.vector_store %arg18[%c3_35, %c0_36, %c0_37], %67 {strides = array<i32>} : memref<8x8x8xbf16, #tpu.memory_space<vmem>>, vector<1x8x8xbf16>,
    %68 = vector.extract_strided_slice %12 {offsets = [0, 88], sizes = [8, 8], strides = [1, 1]} : vector<8x96xf32> to vector<8x8xf32>
    %69 = arith.truncf %68 : vector<8x8xf32> to vector<8x8xbf16>
    %c3_38 = arith.constant 3 : index
    %c0_39 = arith.constant 0 : index
    %c0_40 = arith.constant 0 : index
    %70 = vector.load %arg19[%c3_38, %c0_39, %c0_40] : memref<8x8x8xbf16, #tpu.memory_space<vmem>>, vector<1x8x8xbf16>
    %71 = vector.shape_cast %70 : vector<1x8x8xbf16> to vector<8x8xbf16>
    %72 = vector.shape_cast %69 : vector<8x8xbf16> to vector<1x8x8xbf16>
    tpu.vector_store %arg19[%c3_38, %c0_39, %c0_40], %72 {strides = array<i32>} : memref<8x8x8xbf16, #tpu.memory_space<vmem>>, vector<1x8x8xbf16>,
    %73 = vector.extract_strided_slice %11 {offsets = [8, 0], sizes = [8, 96], strides = [1, 1]} : vector<16x96xf32> to vector<8x96xf32>
    %74 = vector.extract_strided_slice %73 {offsets = [0, 0], sizes = [8, 8], strides = [1, 1]} : vector<8x96xf32> to vector<8x8xf32>
    %75 = arith.truncf %74 : vector<8x8xf32> to vector<8x8xbf16>
    %c4 = arith.constant 4 : index
    %c0_41 = arith.constant 0 : index
    %c0_42 = arith.constant 0 : index
    %76 = vector.load %arg17[%c4, %c0_41, %c0_42] : memref<8x8x8xbf16, #tpu.memory_space<vmem>>, vector<1x8x8xbf16>
    %77 = vector.shape_cast %76 : vector<1x8x8xbf16> to vector<8x8xbf16>
    %78 = vector.shape_cast %75 : vector<8x8xbf16> to vector<1x8x8xbf16>
    tpu.vector_store %arg17[%c4, %c0_41, %c0_42], %78 {strides = array<i32>} : memref<8x8x8xbf16, #tpu.memory_space<vmem>>, vector<1x8x8xbf16>,
    %79 = vector.extract_strided_slice %73 {offsets = [0, 32], sizes = [8, 8], strides = [1, 1]} : vector<8x96xf32> to vector<8x8xf32>
    %80 = arith.truncf %79 : vector<8x8xf32> to vector<8x8xbf16>
    %c4_43 = arith.constant 4 : index
    %c0_44 = arith.constant 0 : index
    %c0_45 = arith.constant 0 : index
    %81 = vector.load %arg18[%c4_43, %c0_44, %c0_45] : memref<8x8x8xbf16, #tpu.memory_space<vmem>>, vector<1x8x8xbf16>
    %82 = vector.shape_cast %81 : vector<1x8x8xbf16> to vector<8x8xbf16>
    %83 = vector.shape_cast %80 : vector<8x8xbf16> to vector<1x8x8xbf16>
    tpu.vector_store %arg18[%c4_43, %c0_44, %c0_45], %83 {strides = array<i32>} : memref<8x8x8xbf16, #tpu.memory_space<vmem>>, vector<1x8x8xbf16>,
    %84 = vector.extract_strided_slice %73 {offsets = [0, 64], sizes = [8, 8], strides = [1, 1]} : vector<8x96xf32> to vector<8x8xf32>
    %85 = arith.truncf %84 : vector<8x8xf32> to vector<8x8xbf16>
    %c4_46 = arith.constant 4 : index
    %c0_47 = arith.constant 0 : index
    %c0_48 = arith.constant 0 : index
    %86 = vector.load %arg19[%c4_46, %c0_47, %c0_48] : memref<8x8x8xbf16, #tpu.memory_space<vmem>>, vector<1x8x8xbf16>
    %87 = vector.shape_cast %86 : vector<1x8x8xbf16> to vector<8x8xbf16>
    %88 = vector.shape_cast %85 : vector<8x8xbf16> to vector<1x8x8xbf16>
    tpu.vector_store %arg19[%c4_46, %c0_47, %c0_48], %88 {strides = array<i32>} : memref<8x8x8xbf16, #tpu.memory_space<vmem>>, vector<1x8x8xbf16>,
    %89 = vector.extract_strided_slice %73 {offsets = [0, 8], sizes = [8, 8], strides = [1, 1]} : vector<8x96xf32> to vector<8x8xf32>
    %90 = arith.truncf %89 : vector<8x8xf32> to vector<8x8xbf16>
    %c5 = arith.constant 5 : index
    %c0_49 = arith.constant 0 : index
    %c0_50 = arith.constant 0 : index
    %91 = vector.load %arg17[%c5, %c0_49, %c0_50] : memref<8x8x8xbf16, #tpu.memory_space<vmem>>, vector<1x8x8xbf16>
    %92 = vector.shape_cast %91 : vector<1x8x8xbf16> to vector<8x8xbf16>
    %93 = vector.shape_cast %90 : vector<8x8xbf16> to vector<1x8x8xbf16>
    tpu.vector_store %arg17[%c5, %c0_49, %c0_50], %93 {strides = array<i32>} : memref<8x8x8xbf16, #tpu.memory_space<vmem>>, vector<1x8x8xbf16>,
    %94 = vector.extract_strided_slice %73 {offsets = [0, 40], sizes = [8, 8], strides = [1, 1]} : vector<8x96xf32> to vector<8x8xf32>
    %95 = arith.truncf %94 : vector<8x8xf32> to vector<8x8xbf16>
    %c5_51 = arith.constant 5 : index
    %c0_52 = arith.constant 0 : index
    %c0_53 = arith.constant 0 : index
    %96 = vector.load %arg18[%c5_51, %c0_52, %c0_53] : memref<8x8x8xbf16, #tpu.memory_space<vmem>>, vector<1x8x8xbf16>
    %97 = vector.shape_cast %96 : vector<1x8x8xbf16> to vector<8x8xbf16>
    %98 = vector.shape_cast %95 : vector<8x8xbf16> to vector<1x8x8xbf16>
    tpu.vector_store %arg18[%c5_51, %c0_52, %c0_53], %98 {strides = array<i32>} : memref<8x8x8xbf16, #tpu.memory_space<vmem>>, vector<1x8x8xbf16>,
    %99 = vector.extract_strided_slice %73 {offsets = [0, 72], sizes = [8, 8], strides = [1, 1]} : vector<8x96xf32> to vector<8x8xf32>
    %100 = arith.truncf %99 : vector<8x8xf32> to vector<8x8xbf16>
    %c5_54 = arith.constant 5 : index
    %c0_55 = arith.constant 0 : index
    %c0_56 = arith.constant 0 : index
    %101 = vector.load %arg19[%c5_54, %c0_55, %c0_56] : memref<8x8x8xbf16, #tpu.memory_space<vmem>>, vector<1x8x8xbf16>
    %102 = vector.shape_cast %101 : vector<1x8x8xbf16> to vector<8x8xbf16>
    %103 = vector.shape_cast %100 : vector<8x8xbf16> to vector<1x8x8xbf16>
    tpu.vector_store %arg19[%c5_54, %c0_55, %c0_56], %103 {strides = array<i32>} : memref<8x8x8xbf16, #tpu.memory_space<vmem>>, vector<1x8x8xbf16>,
    %104 = vector.extract_strided_slice %73 {offsets = [0, 16], sizes = [8, 8], strides = [1, 1]} : vector<8x96xf32> to vector<8x8xf32>
    %105 = arith.truncf %104 : vector<8x8xf32> to vector<8x8xbf16>
    %c6 = arith.constant 6 : index
    %c0_57 = arith.constant 0 : index
    %c0_58 = arith.constant 0 : index
    %106 = vector.load %arg17[%c6, %c0_57, %c0_58] : memref<8x8x8xbf16, #tpu.memory_space<vmem>>, vector<1x8x8xbf16>
    %107 = vector.shape_cast %106 : vector<1x8x8xbf16> to vector<8x8xbf16>
    %108 = vector.shape_cast %105 : vector<8x8xbf16> to vector<1x8x8xbf16>
    tpu.vector_store %arg17[%c6, %c0_57, %c0_58], %108 {strides = array<i32>} : memref<8x8x8xbf16, #tpu.memory_space<vmem>>, vector<1x8x8xbf16>,
    %109 = vector.extract_strided_slice %73 {offsets = [0, 48], sizes = [8, 8], strides = [1, 1]} : vector<8x96xf32> to vector<8x8xf32>
    %110 = arith.truncf %109 : vector<8x8xf32> to vector<8x8xbf16>
    %c6_59 = arith.constant 6 : index
    %c0_60 = arith.constant 0 : index
    %c0_61 = arith.constant 0 : index
    %111 = vector.load %arg18[%c6_59, %c0_60, %c0_61] : memref<8x8x8xbf16, #tpu.memory_space<vmem>>, vector<1x8x8xbf16>
    %112 = vector.shape_cast %111 : vector<1x8x8xbf16> to vector<8x8xbf16>
    %113 = vector.shape_cast %110 : vector<8x8xbf16> to vector<1x8x8xbf16>
    tpu.vector_store %arg18[%c6_59, %c0_60, %c0_61], %113 {strides = array<i32>} : memref<8x8x8xbf16, #tpu.memory_space<vmem>>, vector<1x8x8xbf16>,
    %114 = vector.extract_strided_slice %73 {offsets = [0, 80], sizes = [8, 8], strides = [1, 1]} : vector<8x96xf32> to vector<8x8xf32>
    %115 = arith.truncf %114 : vector<8x8xf32> to vector<8x8xbf16>
    %c6_62 = arith.constant 6 : index
    %c0_63 = arith.constant 0 : index
    %c0_64 = arith.constant 0 : index
    %116 = vector.load %arg19[%c6_62, %c0_63, %c0_64] : memref<8x8x8xbf16, #tpu.memory_space<vmem>>, vector<1x8x8xbf16>
    %117 = vector.shape_cast %116 : vector<1x8x8xbf16> to vector<8x8xbf16>
    %118 = vector.shape_cast %115 : vector<8x8xbf16> to vector<1x8x8xbf16>
    tpu.vector_store %arg19[%c6_62, %c0_63, %c0_64], %118 {strides = array<i32>} : memref<8x8x8xbf16, #tpu.memory_space<vmem>>, vector<1x8x8xbf16>,
    %119 = vector.extract_strided_slice %73 {offsets = [0, 24], sizes = [8, 8], strides = [1, 1]} : vector<8x96xf32> to vector<8x8xf32>
    %120 = arith.truncf %119 : vector<8x8xf32> to vector<8x8xbf16>
    %c7 = arith.constant 7 : index
    %c0_65 = arith.constant 0 : index
    %c0_66 = arith.constant 0 : index
    %121 = vector.load %arg17[%c7, %c0_65, %c0_66] : memref<8x8x8xbf16, #tpu.memory_space<vmem>>, vector<1x8x8xbf16>
    %122 = vector.shape_cast %121 : vector<1x8x8xbf16> to vector<8x8xbf16>
    %123 = vector.shape_cast %120 : vector<8x8xbf16> to vector<1x8x8xbf16>
    tpu.vector_store %arg17[%c7, %c0_65, %c0_66], %123 {strides = array<i32>} : memref<8x8x8xbf16, #tpu.memory_space<vmem>>, vector<1x8x8xbf16>,
    %124 = vector.extract_strided_slice %73 {offsets = [0, 56], sizes = [8, 8], strides = [1, 1]} : vector<8x96xf32> to vector<8x8xf32>
    %125 = arith.truncf %124 : vector<8x8xf32> to vector<8x8xbf16>
    %c7_67 = arith.constant 7 : index
    %c0_68 = arith.constant 0 : index
    %c0_69 = arith.constant 0 : index
    %126 = vector.load %arg18[%c7_67, %c0_68, %c0_69] : memref<8x8x8xbf16, #tpu.memory_space<vmem>>, vector<1x8x8xbf16>
    %127 = vector.shape_cast %126 : vector<1x8x8xbf16> to vector<8x8xbf16>
    %128 = vector.shape_cast %125 : vector<8x8xbf16> to vector<1x8x8xbf16>
    tpu.vector_store %arg18[%c7_67, %c0_68, %c0_69], %128 {strides = array<i32>} : memref<8x8x8xbf16, #tpu.memory_space<vmem>>, vector<1x8x8xbf16>,
    %129 = vector.extract_strided_slice %73 {offsets = [0, 88], sizes = [8, 8], strides = [1, 1]} : vector<8x96xf32> to vector<8x8xf32>
    %130 = arith.truncf %129 : vector<8x8xf32> to vector<8x8xbf16>
    %c7_70 = arith.constant 7 : index
    %c0_71 = arith.constant 0 : index
    %c0_72 = arith.constant 0 : index
    %131 = vector.load %arg19[%c7_70, %c0_71, %c0_72] : memref<8x8x8xbf16, #tpu.memory_space<vmem>>, vector<1x8x8xbf16>
    %132 = vector.shape_cast %131 : vector<1x8x8xbf16> to vector<8x8xbf16>
    %133 = vector.shape_cast %130 : vector<8x8xbf16> to vector<1x8x8xbf16>
    tpu.vector_store %arg19[%c7_70, %c0_71, %c0_72], %133 {strides = array<i32>} : memref<8x8x8xbf16, #tpu.memory_space<vmem>>, vector<1x8x8xbf16>,
    %c0_73 = arith.constant 0 : index
    %c0_74 = arith.constant 0 : index
    %c0_75 = arith.constant 0 : index
    %134 = vector.load %arg17[%c0_73, %c0_74, %c0_75] : memref<8x8x8xbf16, #tpu.memory_space<vmem>>, vector<8x8x8xbf16>
    %c0_76 = arith.constant 0 : index
    %c0_77 = arith.constant 0 : index
    %c0_78 = arith.constant 0 : index
    %135 = vector.load %arg18[%c0_76, %c0_77, %c0_78] : memref<8x8x8xbf16, #tpu.memory_space<vmem>>, vector<8x8x8xbf16>
    %c0_79 = arith.constant 0 : index
    %c0_80 = arith.constant 0 : index
    %c0_81 = arith.constant 0 : index
    %136 = vector.load %arg19[%c0_79, %c0_80, %c0_81] : memref<8x8x8xbf16, #tpu.memory_space<vmem>>, vector<8x8x8xbf16>
    %cst_82 = arith.constant dense<0.000000e+00> : vector<8x8x8xf32>
    %137 = tpu.matmul %134, %135, %cst_82 {dimension_numbers = #tpu.dot_dimension_numbers<[2], [2], [1], [1], [0, 0, 0, 1, 1, 1], [0], [0]>} : vector<8x8x8xbf16>, vector<8x8x8xbf16>, vector<8x8x8xf32> -> vector<8x8x8xf32>
    %cst_83 = arith.constant 0.353553385 : f32
    %138 = vector.broadcast %cst_83 : f32 to vector<8x8x8xf32>
    %139 = arith.mulf %137, %138 : vector<8x8x8xf32>
    %cst_84 = arith.constant dense<0xFF800000> : vector<8x8xf32>
    %140 = vector.multi_reduction <maximumf>, %139, %cst_84 [2] : vector<8x8x8xf32> to vector<8x8xf32>
    %141 = vector.shape_cast %140 : vector<8x8xf32> to vector<8x8x1xf32>
    %142 = vector.broadcast %141 : vector<8x8x1xf32> to vector<8x8x8xf32>
    %143 = arith.subf %139, %142 : vector<8x8x8xf32>
    %144 = math.exp %143 : vector<8x8x8xf32>
    %cst_85 = arith.constant dense<0.000000e+00> : vector<8x8xf32>
    %145 = vector.multi_reduction <add>, %144, %cst_85 [2] : vector<8x8x8xf32> to vector<8x8xf32>
    %146 = vector.shape_cast %145 : vector<8x8xf32> to vector<8x8x1xf32>
    %147 = tpu.reciprocal %146 {approx = true} : vector<8x8x1xf32> -> vector<8x8x1xf32>
    %148 = vector.broadcast %147 : vector<8x8x1xf32> to vector<8x8x8xf32>
    %149 = arith.mulf %144, %148 : vector<8x8x8xf32>
    %150 = arith.truncf %149 : vector<8x8x8xf32> to vector<8x8x8xbf16>
    %cst_86 = arith.constant dense<0.000000e+00> : vector<8x8x8xf32>
    %151 = tpu.matmul %150, %136, %cst_86 {dimension_numbers = #tpu.dot_dimension_numbers<[2], [1], [1], [2], [0, 0, 0, 1, 1, 2], [0], [0]>} : vector<8x8x8xbf16>, vector<8x8x8xbf16>, vector<8x8x8xf32> -> vector<8x8x8xf32>
    %152 = vector.extract_strided_slice %151 {offsets = [0, 0, 0], sizes = [1, 8, 8], strides = [1, 1, 1]} : vector<8x8x8xf32> to vector<1x8x8xf32>
    %153 = vector.shape_cast %152 : vector<1x8x8xf32> to vector<8x8xf32>
    %154 = arith.truncf %153 : vector<8x8xf32> to vector<8x8xbf16>
    %c0_87 = arith.constant 0 : index
    %c0_88 = arith.constant 0 : index
    %155 = vector.load %arg20[%c0_87, %c0_88] : memref<16x32xbf16, #tpu.memory_space<vmem>>, vector<8x8xbf16>
    tpu.vector_store %arg20[%c0_87, %c0_88], %154 {strides = array<i32>} : memref<16x32xbf16, #tpu.memory_space<vmem>>, vector<8x8xbf16>,
    %156 = vector.extract_strided_slice %151 {offsets = [1, 0, 0], sizes = [1, 8, 8], strides = [1, 1, 1]} : vector<8x8x8xf32> to vector<1x8x8xf32>
    %157 = vector.shape_cast %156 : vector<1x8x8xf32> to vector<8x8xf32>
    %158 = arith.truncf %157 : vector<8x8xf32> to vector<8x8xbf16>
    %c0_89 = arith.constant 0 : index
    %c8 = arith.constant 8 : index
    %159 = vector.load %arg20[%c0_89, %c8] : memref<16x32xbf16, #tpu.memory_space<vmem>>, vector<8x8xbf16>
    tpu.vector_store %arg20[%c0_89, %c8], %158 {strides = array<i32>} : memref<16x32xbf16, #tpu.memory_space<vmem>>, vector<8x8xbf16>,
    %160 = vector.extract_strided_slice %151 {offsets = [2, 0, 0], sizes = [1, 8, 8], strides = [1, 1, 1]} : vector<8x8x8xf32> to vector<1x8x8xf32>
    %161 = vector.shape_cast %160 : vector<1x8x8xf32> to vector<8x8xf32>
    %162 = arith.truncf %161 : vector<8x8xf32> to vector<8x8xbf16>
    %c0_90 = arith.constant 0 : index
    %c16 = arith.constant 16 : index
    %163 = vector.load %arg20[%c0_90, %c16] : memref<16x32xbf16, #tpu.memory_space<vmem>>, vector<8x8xbf16>
    tpu.vector_store %arg20[%c0_90, %c16], %162 {strides = array<i32>} : memref<16x32xbf16, #tpu.memory_space<vmem>>, vector<8x8xbf16>,
    %164 = vector.extract_strided_slice %151 {offsets = [3, 0, 0], sizes = [1, 8, 8], strides = [1, 1, 1]} : vector<8x8x8xf32> to vector<1x8x8xf32>
    %165 = vector.shape_cast %164 : vector<1x8x8xf32> to vector<8x8xf32>
    %166 = arith.truncf %165 : vector<8x8xf32> to vector<8x8xbf16>
    %c0_91 = arith.constant 0 : index
    %c24 = arith.constant 24 : index
    %167 = vector.load %arg20[%c0_91, %c24] : memref<16x32xbf16, #tpu.memory_space<vmem>>, vector<8x8xbf16>
    tpu.vector_store %arg20[%c0_91, %c24], %166 {strides = array<i32>} : memref<16x32xbf16, #tpu.memory_space<vmem>>, vector<8x8xbf16>,
    %168 = vector.extract_strided_slice %151 {offsets = [4, 0, 0], sizes = [1, 8, 8], strides = [1, 1, 1]} : vector<8x8x8xf32> to vector<1x8x8xf32>
    %169 = vector.shape_cast %168 : vector<1x8x8xf32> to vector<8x8xf32>
    %170 = arith.truncf %169 : vector<8x8xf32> to vector<8x8xbf16>
    %c8_92 = arith.constant 8 : index
    %c0_93 = arith.constant 0 : index
    %171 = vector.load %arg20[%c8_92, %c0_93] : memref<16x32xbf16, #tpu.memory_space<vmem>>, vector<8x8xbf16>
    tpu.vector_store %arg20[%c8_92, %c0_93], %170 {strides = array<i32>} : memref<16x32xbf16, #tpu.memory_space<vmem>>, vector<8x8xbf16>,
    %172 = vector.extract_strided_slice %151 {offsets = [5, 0, 0], sizes = [1, 8, 8], strides = [1, 1, 1]} : vector<8x8x8xf32> to vector<1x8x8xf32>
    %173 = vector.shape_cast %172 : vector<1x8x8xf32> to vector<8x8xf32>
    %174 = arith.truncf %173 : vector<8x8xf32> to vector<8x8xbf16>
    %c8_94 = arith.constant 8 : index
    %c8_95 = arith.constant 8 : index
    %175 = vector.load %arg20[%c8_94, %c8_95] : memref<16x32xbf16, #tpu.memory_space<vmem>>, vector<8x8xbf16>
    tpu.vector_store %arg20[%c8_94, %c8_95], %174 {strides = array<i32>} : memref<16x32xbf16, #tpu.memory_space<vmem>>, vector<8x8xbf16>,
    %176 = vector.extract_strided_slice %151 {offsets = [6, 0, 0], sizes = [1, 8, 8], strides = [1, 1, 1]} : vector<8x8x8xf32> to vector<1x8x8xf32>
    %177 = vector.shape_cast %176 : vector<1x8x8xf32> to vector<8x8xf32>
    %178 = arith.truncf %177 : vector<8x8xf32> to vector<8x8xbf16>
    %c8_96 = arith.constant 8 : index
    %c16_97 = arith.constant 16 : index
    %179 = vector.load %arg20[%c8_96, %c16_97] : memref<16x32xbf16, #tpu.memory_space<vmem>>, vector<8x8xbf16>
    tpu.vector_store %arg20[%c8_96, %c16_97], %178 {strides = array<i32>} : memref<16x32xbf16, #tpu.memory_space<vmem>>, vector<8x8xbf16>,
    %180 = vector.extract_strided_slice %151 {offsets = [7, 0, 0], sizes = [1, 8, 8], strides = [1, 1, 1]} : vector<8x8x8xf32> to vector<1x8x8xf32>
    %181 = vector.shape_cast %180 : vector<1x8x8xf32> to vector<8x8xf32>
    %182 = arith.truncf %181 : vector<8x8xf32> to vector<8x8xbf16>
    %c8_98 = arith.constant 8 : index
    %c24_99 = arith.constant 24 : index
    %183 = vector.load %arg20[%c8_98, %c24_99] : memref<16x32xbf16, #tpu.memory_space<vmem>>, vector<8x8xbf16>
    tpu.vector_store %arg20[%c8_98, %c24_99], %182 {strides = array<i32>} : memref<16x32xbf16, #tpu.memory_space<vmem>>, vector<8x8xbf16>,
    %c0_100 = arith.constant 0 : index
    %c0_101 = arith.constant 0 : index
    %184 = vector.load %arg20[%c0_100, %c0_101] : memref<16x32xbf16, #tpu.memory_space<vmem>>, vector<16x32xbf16>
    %c0_102 = arith.constant 0 : index
    %c0_103 = arith.constant 0 : index
    %c0_104 = arith.constant 0 : index
    %185 = vector.load %arg5[%c0_102, %c0_103, %c0_104] : memref<1x32x32xbf16, #tpu.memory_space<vmem>>, vector<1x32x32xbf16>
    %186 = vector.shape_cast %185 : vector<1x32x32xbf16> to vector<32x32xbf16>
    %cst_105 = arith.constant dense<0.000000e+00> : vector<16x32xf32>
    %187 = tpu.matmul %184, %186, %cst_105 {dimension_numbers = #tpu.dot_dimension_numbers<[1], [0], [0], [1], [0, 0, 1, 1], [], []>} : vector<16x32xbf16>, vector<32x32xbf16>, vector<16x32xf32> -> vector<16x32xf32>
    %c0_106 = arith.constant 0 : index
    %c0_107 = arith.constant 0 : index
    %c0_108 = arith.constant 0 : index
    %188 = vector.load %arg6[%c0_106, %c0_107, %c0_108] : memref<1x1x32xf32, #tpu.memory_space<vmem>>, vector<1x1x32xf32>
    %189 = vector.shape_cast %188 : vector<1x1x32xf32> to vector<1x32xf32>
    %190 = vector.broadcast %189 : vector<1x32xf32> to vector<16x32xf32>
    %191 = arith.addf %187, %190 : vector<16x32xf32>
    %192 = arith.addf %3, %191 : vector<16x32xf32>
    %c0_109 = arith.constant 0 : index
    %c0_110 = arith.constant 0 : index
    %c0_111 = arith.constant 0 : index
    %193 = vector.load %arg7[%c0_109, %c0_110, %c0_111] : memref<1x1x32xf32, #tpu.memory_space<vmem>>, vector<1x1x32xf32>
    %194 = vector.shape_cast %193 : vector<1x1x32xf32> to vector<1x32xf32>
    %c0_112 = arith.constant 0 : index
    %c0_113 = arith.constant 0 : index
    %c0_114 = arith.constant 0 : index
    %195 = vector.load %arg8[%c0_112, %c0_113, %c0_114] : memref<1x1x32xf32, #tpu.memory_space<vmem>>, vector<1x1x32xf32>
    %196 = vector.shape_cast %195 : vector<1x1x32xf32> to vector<1x32xf32>
    %cst_115 = arith.constant dense<0.000000e+00> : vector<16xf32>
    %197 = vector.multi_reduction <add>, %192, %cst_115 [1] : vector<16x32xf32> to vector<16xf32>
    %198 = vector.shape_cast %197 : vector<16xf32> to vector<16x1xf32>
    %cst_116 = arith.constant 3.200000e+01 : f32
    %199 = vector.broadcast %cst_116 : f32 to vector<16x1xf32>
    %200 = arith.divf %198, %199 : vector<16x1xf32>
    %201 = vector.broadcast %200 : vector<16x1xf32> to vector<16x32xf32>
    %202 = arith.subf %192, %201 : vector<16x32xf32>
    %203 = arith.mulf %202, %202 : vector<16x32xf32>
    %cst_117 = arith.constant dense<0.000000e+00> : vector<16xf32>
    %204 = vector.multi_reduction <add>, %203, %cst_117 [1] : vector<16x32xf32> to vector<16xf32>
    %205 = vector.shape_cast %204 : vector<16xf32> to vector<16x1xf32>
    %cst_118 = arith.constant 3.200000e+01 : f32
    %206 = vector.broadcast %cst_118 : f32 to vector<16x1xf32>
    %207 = arith.divf %205, %206 : vector<16x1xf32>
    %208 = vector.broadcast %200 : vector<16x1xf32> to vector<16x32xf32>
    %209 = arith.subf %192, %208 : vector<16x32xf32>
    %cst_119 = arith.constant 9.99999974E-6 : f32
    %210 = vector.broadcast %cst_119 : f32 to vector<16x1xf32>
    %211 = arith.addf %207, %210 : vector<16x1xf32>
    %212 = math.rsqrt %211 : vector<16x1xf32>
    %213 = vector.broadcast %212 : vector<16x1xf32> to vector<16x32xf32>
    %214 = arith.mulf %209, %213 : vector<16x32xf32>
    %215 = vector.broadcast %194 : vector<1x32xf32> to vector<16x32xf32>
    %216 = arith.mulf %214, %215 : vector<16x32xf32>
    %217 = vector.broadcast %196 : vector<1x32xf32> to vector<16x32xf32>
    %218 = arith.addf %216, %217 : vector<16x32xf32>
    %219 = arith.truncf %218 : vector<16x32xf32> to vector<16x32xbf16>
    %c0_120 = arith.constant 0 : index
    %c0_121 = arith.constant 0 : index
    %c0_122 = arith.constant 0 : index
    %220 = vector.load %arg9[%c0_120, %c0_121, %c0_122] : memref<1x32x64xbf16, #tpu.memory_space<vmem>>, vector<1x32x64xbf16>
    %221 = vector.shape_cast %220 : vector<1x32x64xbf16> to vector<32x64xbf16>
    %cst_123 = arith.constant dense<0.000000e+00> : vector<16x64xf32>
    %222 = tpu.matmul %219, %221, %cst_123 {dimension_numbers = #tpu.dot_dimension_numbers<[1], [0], [0], [1], [0, 0, 1, 1], [], []>} : vector<16x32xbf16>, vector<32x64xbf16>, vector<16x64xf32> -> vector<16x64xf32>
    %c0_124 = arith.constant 0 : index
    %c0_125 = arith.constant 0 : index
    %c0_126 = arith.constant 0 : index
    %223 = vector.load %arg10[%c0_124, %c0_125, %c0_126] : memref<1x1x64xf32, #tpu.memory_space<vmem>>, vector<1x1x64xf32>
    %224 = vector.shape_cast %223 : vector<1x1x64xf32> to vector<1x64xf32>
    %225 = vector.broadcast %224 : vector<1x64xf32> to vector<16x64xf32>
    %226 = arith.addf %222, %225 : vector<16x64xf32>
    %cst_127 = arith.constant 0.000000e+00 : f32
    %227 = vector.broadcast %cst_127 : f32 to vector<16x64xf32>
    %228 = arith.maximumf %226, %227 : vector<16x64xf32>
    %229 = arith.truncf %228 : vector<16x64xf32> to vector<16x64xbf16>
    %c0_128 = arith.constant 0 : index
    %c0_129 = arith.constant 0 : index
    %c0_130 = arith.constant 0 : index
    %230 = vector.load %arg11[%c0_128, %c0_129, %c0_130] : memref<1x64x32xbf16, #tpu.memory_space<vmem>>, vector<1x64x32xbf16>
    %231 = vector.shape_cast %230 : vector<1x64x32xbf16> to vector<64x32xbf16>
    %cst_131 = arith.constant dense<0.000000e+00> : vector<16x32xf32>
    %232 = tpu.matmul %229, %231, %cst_131 {dimension_numbers = #tpu.dot_dimension_numbers<[1], [0], [0], [1], [0, 0, 1, 1], [], []>} : vector<16x64xbf16>, vector<64x32xbf16>, vector<16x32xf32> -> vector<16x32xf32>
    %c0_132 = arith.constant 0 : index
    %c0_133 = arith.constant 0 : index
    %c0_134 = arith.constant 0 : index
    %233 = vector.load %arg12[%c0_132, %c0_133, %c0_134] : memref<1x1x32xf32, #tpu.memory_space<vmem>>, vector<1x1x32xf32>
    %234 = vector.shape_cast %233 : vector<1x1x32xf32> to vector<1x32xf32>
    %235 = vector.broadcast %234 : vector<1x32xf32> to vector<16x32xf32>
    %236 = arith.addf %232, %235 : vector<16x32xf32>
    %237 = arith.addf %218, %236 : vector<16x32xf32>
    %c0_135 = arith.constant 0 : index
    %c0_136 = arith.constant 0 : index
    %c0_137 = arith.constant 0 : index
    %238 = vector.load %arg13[%c0_135, %c0_136, %c0_137] : memref<1x1x32xf32, #tpu.memory_space<vmem>>, vector<1x1x32xf32>
    %239 = vector.shape_cast %238 : vector<1x1x32xf32> to vector<1x32xf32>
    %c0_138 = arith.constant 0 : index
    %c0_139 = arith.constant 0 : index
    %c0_140 = arith.constant 0 : index
    %240 = vector.load %arg14[%c0_138, %c0_139, %c0_140] : memref<1x1x32xf32, #tpu.memory_space<vmem>>, vector<1x1x32xf32>
    %241 = vector.shape_cast %240 : vector<1x1x32xf32> to vector<1x32xf32>
    %cst_141 = arith.constant dense<0.000000e+00> : vector<16xf32>
    %242 = vector.multi_reduction <add>, %237, %cst_141 [1] : vector<16x32xf32> to vector<16xf32>
    %243 = vector.shape_cast %242 : vector<16xf32> to vector<16x1xf32>
    %cst_142 = arith.constant 3.200000e+01 : f32
    %244 = vector.broadcast %cst_142 : f32 to vector<16x1xf32>
    %245 = arith.divf %243, %244 : vector<16x1xf32>
    %246 = vector.broadcast %245 : vector<16x1xf32> to vector<16x32xf32>
    %247 = arith.subf %237, %246 : vector<16x32xf32>
    %248 = arith.mulf %247, %247 : vector<16x32xf32>
    %cst_143 = arith.constant dense<0.000000e+00> : vector<16xf32>
    %249 = vector.multi_reduction <add>, %248, %cst_143 [1] : vector<16x32xf32> to vector<16xf32>
    %250 = vector.shape_cast %249 : vector<16xf32> to vector<16x1xf32>
    %cst_144 = arith.constant 3.200000e+01 : f32
    %251 = vector.broadcast %cst_144 : f32 to vector<16x1xf32>
    %252 = arith.divf %250, %251 : vector<16x1xf32>
    %253 = vector.broadcast %245 : vector<16x1xf32> to vector<16x32xf32>
    %254 = arith.subf %237, %253 : vector<16x32xf32>
    %cst_145 = arith.constant 9.99999974E-6 : f32
    %255 = vector.broadcast %cst_145 : f32 to vector<16x1xf32>
    %256 = arith.addf %252, %255 : vector<16x1xf32>
    %257 = math.rsqrt %256 : vector<16x1xf32>
    %258 = vector.broadcast %257 : vector<16x1xf32> to vector<16x32xf32>
    %259 = arith.mulf %254, %258 : vector<16x32xf32>
    %260 = vector.broadcast %239 : vector<1x32xf32> to vector<16x32xf32>
    %261 = arith.mulf %259, %260 : vector<16x32xf32>
    %262 = vector.broadcast %241 : vector<1x32xf32> to vector<16x32xf32>
    %263 = arith.addf %261, %262 : vector<16x32xf32>
    %c0_146 = arith.constant 0 : index
    %c0_147 = arith.constant 0 : index
    %264 = vector.load %arg16[%c0_146, %c0_147] : memref<16x32xf32, #tpu.memory_space<vmem>>, vector<16x32xf32>
    tpu.vector_store %arg16[%c0_146, %c0_147], %263 {strides = array<i32>} : memref<16x32xf32, #tpu.memory_space<vmem>>, vector<16x32xf32>,
    %c1_i32 = arith.constant 1 : i32
    %265 = arith.cmpi eq, %arg1, %c1_i32 : i32
    %266 = arith.extui %265 : i1 to i32
    %c0_i32_148 = arith.constant 0 : i32
    %267 = arith.cmpi ne, %266, %c0_i32_148 : i32
    scf.if %267 {
      %268 = vector.shape_cast %263 : vector<16x32xf32> to vector<2x8x32xf32>
      %c0_149 = arith.constant 0 : index
      %c0_150 = arith.constant 0 : index
      %c0_151 = arith.constant 0 : index
      %269 = vector.load %arg15[%c0_149, %c0_150, %c0_151] : memref<2x8x32xf32, #tpu.memory_space<vmem>>, vector<2x8x32xf32>
      tpu.vector_store %arg15[%c0_149, %c0_150, %c0_151], %268 {strides = array<i32>} : memref<2x8x32xf32, #tpu.memory_space<vmem>>, vector<2x8x32xf32>,
    } else {
    }
    return
  }
  func.func @transform_0(%arg0: i32, %arg1: i32) -> (i32, i32, i32) {
    %c0_i32 = arith.constant 0 : i32
    %c0_i32_0 = arith.constant 0 : i32
    %c0_i32_1 = arith.constant 0 : i32
    return %arg0, %c0_i32, %c0_i32_0 : i32, i32, i32
  }
  func.func @transform_1(%arg0: i32, %arg1: i32) -> (i32, i32, i32) {
    %c0_i32 = arith.constant 0 : i32
    %c0_i32_0 = arith.constant 0 : i32
    %c0_i32_1 = arith.constant 0 : i32
    return %arg1, %c0_i32, %c0_i32_0 : i32, i32, i32
  }
  func.func @transform_2(%arg0: i32, %arg1: i32) -> (i32, i32, i32) {
    %c0_i32 = arith.constant 0 : i32
    %c0_i32_0 = arith.constant 0 : i32
    %c0_i32_1 = arith.constant 0 : i32
    return %arg1, %c0_i32, %c0_i32_0 : i32, i32, i32
  }
  func.func @transform_3(%arg0: i32, %arg1: i32) -> (i32, i32, i32) {
    %c0_i32 = arith.constant 0 : i32
    %c0_i32_0 = arith.constant 0 : i32
    %c0_i32_1 = arith.constant 0 : i32
    return %arg1, %c0_i32, %c0_i32_0 : i32, i32, i32
  }
  func.func @transform_4(%arg0: i32, %arg1: i32) -> (i32, i32, i32) {
    %c0_i32 = arith.constant 0 : i32
    %c0_i32_0 = arith.constant 0 : i32
    %c0_i32_1 = arith.constant 0 : i32
    return %arg1, %c0_i32, %c0_i32_0 : i32, i32, i32
  }
  func.func @transform_5(%arg0: i32, %arg1: i32) -> (i32, i32, i32) {
    %c0_i32 = arith.constant 0 : i32
    %c0_i32_0 = arith.constant 0 : i32
    %c0_i32_1 = arith.constant 0 : i32
    return %arg1, %c0_i32, %c0_i32_0 : i32, i32, i32
  }
  func.func @transform_6(%arg0: i32, %arg1: i32) -> (i32, i32, i32) {
    %c0_i32 = arith.constant 0 : i32
    %c0_i32_0 = arith.constant 0 : i32
    %c0_i32_1 = arith.constant 0 : i32
    return %arg1, %c0_i32, %c0_i32_0 : i32, i32, i32
  }
  func.func @transform_7(%arg0: i32, %arg1: i32) -> (i32, i32, i32) {
    %c0_i32 = arith.constant 0 : i32
    %c0_i32_0 = arith.constant 0 : i32
    %c0_i32_1 = arith.constant 0 : i32
    return %arg1, %c0_i32, %c0_i32_0 : i32, i32, i32
  }
  func.func @transform_8(%arg0: i32, %arg1: i32) -> (i32, i32, i32) {
    %c0_i32 = arith.constant 0 : i32
    %c0_i32_0 = arith.constant 0 : i32
    %c0_i32_1 = arith.constant 0 : i32
    return %arg1, %c0_i32, %c0_i32_0 : i32, i32, i32
  }
  func.func @transform_9(%arg0: i32, %arg1: i32) -> (i32, i32, i32) {
    %c0_i32 = arith.constant 0 : i32
    %c0_i32_0 = arith.constant 0 : i32
    %c0_i32_1 = arith.constant 0 : i32
    return %arg1, %c0_i32, %c0_i32_0 : i32, i32, i32
  }
  func.func @transform_10(%arg0: i32, %arg1: i32) -> (i32, i32, i32) {
    %c0_i32 = arith.constant 0 : i32
    %c0_i32_0 = arith.constant 0 : i32
    %c0_i32_1 = arith.constant 0 : i32
    return %arg1, %c0_i32, %c0_i32_0 : i32, i32, i32
  }
  func.func @transform_11(%arg0: i32, %arg1: i32) -> (i32, i32, i32) {
    %c0_i32 = arith.constant 0 : i32
    %c0_i32_0 = arith.constant 0 : i32
    %c0_i32_1 = arith.constant 0 : i32
    return %arg1, %c0_i32, %c0_i32_0 : i32, i32, i32
  }
  func.func @transform_12(%arg0: i32, %arg1: i32) -> (i32, i32, i32) {
    %c0_i32 = arith.constant 0 : i32
    %c0_i32_0 = arith.constant 0 : i32
    %c0_i32_1 = arith.constant 0 : i32
    return %arg1, %c0_i32, %c0_i32_0 : i32, i32, i32
  }
  func.func @transform_13(%arg0: i32, %arg1: i32) -> (i32, i32, i32) {
    %c0_i32 = arith.constant 0 : i32
    %c0_i32_0 = arith.constant 0 : i32
    %c0_i32_1 = arith.constant 0 : i32
    return %arg0, %c0_i32, %c0_i32_0 : i32, i32, i32
  }
}

</mosaic_0001>

<bundles_post_ra>
// kernel: tpu_custom_call.1
= control target key start
LH: loop header
LB: loop body
LE: loop exit
PB: predicated region body
PF: predicated region fallthrough
CT: control target
= control target key end

     0   :  { %s3729_s0 = inlined_call_operand.hbm [shape: f32[2,8,32], index: 0, kind: input, shape index: {}]   ;;  %s3730_s1 = inlined_call_operand.vmem [shape: bf16[2,32,96], index: 1, kind: input, shape index: {}]   ;;  %s3731_s2 = inlined_call_operand.vmem [shape: f32[2,1,96], index: 2, kind: input, shape index: {}]   ;;  %s3732_s3 = inlined_call_operand.vmem [shape: bf16[2,32,32], index: 3, kind: input, shape index: {}]   ;;  %s3733_s4 = inlined_call_operand.hbm [shape: f32[2,1,32], index: 4, kind: input, shape index: {}]   ;;  %s3734_s5 = inlined_call_operand.hbm [shape: f32[2,1,32], index: 5, kind: input, shape index: {}]   ;;  %s3735_s6 = inlined_call_operand.hbm [shape: f32[2,1,32], index: 6, kind: input, shape index: {}]   ;;  %s3736_s7 = inlined_call_operand.vmem [shape: bf16[2,32,64], index: 7, kind: input, shape index: {}]   ;;  %s3737_s8 = inlined_call_operand.hbm [shape: f32[2,1,64], index: 8, kind: input, shape index: {}]   ;;  %s3738_s9 = inlined_call_operand.vmem [shape: bf16[2,64,32], index: 9, kind: input, shape index: {}]   ;;  %s3739_s10 = inlined_call_operand.vmem [shape: f32[2,1,32], index: 10, kind: input, shape index: {}]   ;;  %s3740_s11 = inlined_call_operand.vmem [shape: f32[2,1,32], index: 11, kind: input, shape index: {}]   ;;  %s3741_s12 = inlined_call_operand.vmem [shape: f32[2,1,32], index: 12, kind: input, shape index: {}]   ;;  %s3742_s13 = inlined_call_operand.hbm [shape: f32[2,8,32], index: 13, kind: output, shape index: {}]  }
   0x1   :  { %3755 = sst [smem:[#allocation26_spill]] %s3729_s0 }
   0x2   :  { %3756 = sst [smem:[#allocation27_spill]] %s3730_s1 }
   0x3   :  { %3757 = sst [smem:[#allocation28_spill]] %s3732_s3 }
   0x4   :  { %3758 = sst [smem:[#allocation29_spill]] %s3733_s4 }
   0x5   :  { %3759 = sst [smem:[#allocation30_spill]] %s3735_s6 }
   0x6   :  { %3760 = sst [smem:[#allocation31_spill]] %s3736_s7 }
   0x7   :  { %3761 = sst [smem:[#allocation32_spill]] %s3738_s9 }
   0x8   :  { %3762 = sst [smem:[#allocation33_spill]] %s3739_s10 }
   0x9   :  { %3763 = sst [smem:[#allocation34_spill]] %s3740_s11 }
   0xa   :  { %3764 = sst [smem:[#allocation35_spill]] %s3741_s12 }
   0xb   :  { %3765 = sst [smem:[#allocation36_spill]] %s3742_s13 }
   0xc   :  { %18 = vsyncpa [#allocation8], 0 }
   0xd   :  { %19 = vsyncpa [#allocation11], 0 }
   0xe   :  { %21 = vsyncpa [#allocation11 + $0x1], 0 }
   0xf   :  { %22 = vsyncpa [#allocation14], 0 }
  0x10   :  { %24 = vsyncpa [#allocation14 + $0x1], 0 }
  0x11   :  { %25 = vsyncpa [#allocation9], 0  ;;  %s3119_s25 = smov 0   ;;  %s3121_s26 = smov 0  }
  0x12   :  { %s3123_s27 = smov 0   ;;  %s3125_s28 = smov 0  }
  0x13   :  { %s3127_s29 = smov 0   ;;  %s3129_s30 = smov 0  }
  0x14 LB: > { %3766 = sst [smem:[#allocation21_spill]] %s3010_s27  ;;  %s40_s14 = sadd.s32 1, %s3018_s29  ;;  %s3022_s30 = sphi %s3129_s30, %s31_s30   ;;  %s3018_s29 = sphi %s3127_s29, %s3808_s29   ;;  %s3014_s28 = sphi %s3125_s28, %s3807_s28   ;;  %s3010_s27 = sphi %s3123_s27, %s3806_s27   ;;  %s3006_s26 = sphi %s3121_s26, %s3810_s26   ;;  %s3002_s25 = sphi %s3119_s25, %s3809_s25  }
  0x15   : > { %3767 = sst [smem:[#allocation22_spill]] %s3018_s29  ;;  %s154_s15 = sadd.s32 1, %s3010_s27 }
  0x16   : > { %3768 = sst [smem:[#allocation23_spill]] %s3022_s30  ;;  %p41_p0 = scmp.ge.s32.totalorder %s40_s14, 2 }
  0x17   : > { %p161_p1 = scmp.ne.s32.totalorder %s3010_s27, %s3006_s26  ;;  %p162_p2 = scmp.eq.s32.totalorder %s3022_s30, 0 }
  0x18   : > { %s3812_s14 = smov (%p41_p0, %s40_s14), 0  ;;  %p2663_p4 = scmp.lt.s32.totalorder %s3022_s30, 2 }
  0x19   : > { %3769 = sst [smem:[#allocation24_spill]] %s3812_s14  ;;  %p163_p3 = por %p162_p2, %p161_p1 }
  0x1a   : > { %s151_s16 = ssub.s32 %s3018_s29, %s3812_s14  ;;  %s3161_s18 = sand.u32 1, %s3010_s27  }
  0x1b   : > { %p152_p5 = scmp.eq.s32.totalorder %s151_s16, 0  ;;  %s3164_s19 = sshll.u32 %s3018_s29, 4 }
  0x1c   : > { %s3771_s4 = sld [smem:[#allocation29_spill]]  ;;  %s466_s24 = scalar_lea.vmem [#allocation10], %s3161_s18 }
  0x1d   : > { %s3167_s20 = scalar_select %p152_p5, %s3010_s27, %s154_s15  }
  0x1e   : > { %s473_s17 = sshll.u32 %s466_s24, 4  ;;  %p3176_p6 = pnand %p2663_p4, %p163_p3  ;;  %s3180_s17 = int_to_ptr.vmem [resolvable:$true] %s473_s17 }
  0x1f   : > { %3770 = sst [smem:[#allocation25_spill]] %s3167_s20  ;;  %s3773_s15 = sand.u32 1, %s3022_s30  }
  0x20   : > { %s3772_s16 = scalar_select %p3176_p6, 1, 0 }
  0x21   : > { %s3184_s14 = scalar_lea.sflag [#allocation11], %s3773_s15  ;;  %p3190_p8 = pneg %p3176_p6 }
  0x22   : > { %s3173_s23 = scalar_lea.hbm %s3771_s4, %s3164_s19  ;;  %s2791_s20 = scalar_lea.hbm %s3771_s4, 32 }
  0x23   : > { %s2786_s29 = scalar_lea.hbm %s3173_s23, 16  ;;  %p2792_p11 = scmp.lt.u32.totalorder %s3173_s23, %s3771_s4 }
  0x24   : > { %p2787_p7 = scmp.ne.s32.totalorder %s3173_s23, %s2786_s29  ;;  %p2793_p12 = scmp.lt.u32.totalorder %s2791_s20, %s2786_s29 }
  0x25   : > { %s3774_s21 = scalar_select %p3190_p8, 1, 0 }
  0x26   : > { %p2789_p9 = pnand %p3190_p8, %p2787_p7  ;;  %p2794_p13 = por %p2793_p12, %p2792_p11 }
  0x27   : > { %p2795_p0 = scmp.lt.u32.totalorder %s2786_s29, %s3173_s23 }
  0x28   : > { %p2790_p10 = pneg %p2789_p9 }
  0x29   : > { %p2796_p1 = por %p2795_p0, %p2794_p13 }
  0x2b   : > { %p2797_p2 = pnand %p2796_p1, %p2790_p10 }
  0x2d   : > { %2800 = shalt.err (!%p2797_p2)
}
  0x2e   : > { %s2801_s15 = scalar_lea.vmem %s3180_s17, 16  ;;  %s3024_s22 = smov [#allocation10]  }
  0x2f   : > { %p2802_p3 = scmp.ne.s32.totalorder %s3180_s17, %s2801_s15  ;;  %s2806_s24 = sshll.u32 %s3024_s22, 4  ;;  %s2807_s24 = int_to_ptr.vmem [resolvable:$false] %s2806_s24 }
  0x30   : > { %s2808_s13 = scalar_lea.vmem %s2807_s24, 32  ;;  %p2809_p7 = scmp.lt.s32.totalorder %s3180_s17, %s2807_s24 }
  0x31   : > { %p2804_p4 = pnand %p2802_p3, %p3190_p8  ;;  %p2810_p9 = scmp.lt.s32.totalorder %s2808_s13, %s2801_s15 }
  0x33   : > { %p2805_p5 = pneg %p2804_p4  ;;  %p2811_p11 = por %p2810_p9, %p2809_p7 }
  0x35   : > { %p2812_p12 = pnand %p2811_p11, %p2805_p5 }
  0x37   : > { %2815 = shalt.err (!%p2812_p12)
}
  0x38   : > { %2652 = dma.hbm_to_vmem [thread:$0]  (!%p3176_p6), %s3173_s23, 16, %s3180_s17, %s3184_s14  }
  0x39   : > { %s3775_s6 = sld [smem:[#allocation30_spill]]  ;;  %s500_s15 = scalar_lea.vmem [#allocation13], %s3161_s18 }
  0x3a   : > { %s507_s22 = sshll.u32 %s500_s15, 4  ;;  %s3776_s24 = sand.u32 1, %s3022_s30   ;;  %s508_s22 = int_to_ptr.vmem [resolvable:$true] %s507_s22 }
  0x3b   : > { %s3223_s13 = scalar_lea.sflag [#allocation14], %s3776_s24 }
  0x3f   : > { %s3218_s20 = scalar_lea.hbm %s3775_s6, %s3164_s19  ;;  %s2821_s27 = scalar_lea.hbm %s3775_s6, 32 }
  0x40   : > { %s2816_s4 = scalar_lea.hbm %s3218_s20, 16  ;;  %p2822_p1 = scmp.lt.u32.totalorder %s3218_s20, %s3775_s6 }
  0x41   : > { %p2817_p10 = scmp.ne.s32.totalorder %s3218_s20, %s2816_s4  ;;  %p2823_p2 = scmp.lt.u32.totalorder %s2821_s27, %s2816_s4 }
  0x42   : > { %p2825_p4 = scmp.lt.u32.totalorder %s2816_s4, %s3218_s20 }
  0x43   : > { %p2819_p13 = pnand %p2817_p10, %p3190_p8  ;;  %p2824_p3 = por %p2823_p2, %p2822_p1 }
  0x45   : > { %p2820_p0 = pneg %p2819_p13  ;;  %p2826_p5 = por %p2825_p4, %p2824_p3 }
  0x47   : > { %p2827_p7 = pnand %p2826_p5, %p2820_p0 }
  0x49   : > { %2830 = shalt.err (!%p2827_p7)
}
  0x4a   : > { %s2831_s15 = scalar_lea.vmem %s508_s22, 16  ;;  %s3025_s24 = smov [#allocation13]  }
  0x4b   : > { %p2832_p9 = scmp.ne.s32.totalorder %s508_s22, %s2831_s15  ;;  %s2836_s11 = sshll.u32 %s3025_s24, 4  ;;  %s2837_s11 = int_to_ptr.vmem [resolvable:$false] %s2836_s11 }
  0x4c   : > { %s2838_s17 = scalar_lea.vmem %s2837_s11, 32  ;;  %p2839_p10 = scmp.lt.s32.totalorder %s508_s22, %s2837_s11 }
  0x4d   : > { %p2834_p11 = pnand %p2832_p9, %p3190_p8  ;;  %p2840_p13 = scmp.lt.s32.totalorder %s2838_s17, %s2831_s15 }
  0x4f   : > { %p2835_p12 = pneg %p2834_p11  ;;  %p2841_p6 = por %p2840_p13, %p2839_p10 }
  0x51   : > { %p2842_p1 = pnand %p2841_p6, %p2835_p12 }
  0x53   : > { %2845 = shalt.err (!%p2842_p1)
}
  0x54   : > { %p3777_p2 = scmp.ne.s32.totalorder %s3772_s16, 0  ;;  %s3244_s4 = sadd.s32 4294967295, %s3022_s30  }
  0x55   : > { %p167_p0 = scmp.ne.s32.totalorder %s3006_s26, %s3002_s25  ;;  %p3750_p6 = scmp.eq.s32.totalorder %s3244_s4, 0 }
  0x56   : > { %2658 = dma.hbm_to_vmem [thread:$0]  (!%p3777_p2), %s3218_s20, 16, %s508_s22, %s3223_s13  }
  0x57   : > { %p2382_p3 = scmp.ge.s32.totalorder %s3022_s30, 1  ;;  %p412_p4 = scmp.lt.s32.totalorder %s3022_s30, 3 }
  0x58   : > { %p3253_p5 = por %p3750_p6, %p167_p0  ;;  %s3026_s20 = smov [#allocation7]  }
  0x59   : > { %p3257_p7 = pnand %p2382_p3, %p412_p4  ;;  %s427_s22 = sshll.u32 %s3026_s20, 4  ;;  %s428_s22 = int_to_ptr.vmem [resolvable:$true] %s427_s22 }
  0x5a   : > { %s3778_s11 = scalar_select %p3253_p5, 1, 0 }
  0x5b   : > { %s3779_s12 = scalar_select %p3257_p7, 1, 0 }
  0x5c   : > { %p2645_p9 = pneg %p3257_p7  ;;  %s3273_s29 = scalar_lea.hbm %s3734_s5, %s3164_s19 }
  0x5d   : > { %s483_s15 = scalar_lea.vmem [#allocation12], %s3161_s18  ;;  %s3781_s0 = sld [smem:[#allocation26_spill]] }
  0x5e   : > { %p3265_p11 = pnand %p2645_p9, %p3750_p6  ;;  %s490_s24 = sshll.u32 %s483_s15, 4  ;;  %s3276_s24 = int_to_ptr.vmem [resolvable:$true] %s490_s24 }
  0x60   : > { %p2848_p10 = pneg %p3265_p11 }
  0x63   : > { %s2846_s6 = scalar_lea.hbm %s3781_s0, 256 }
  0x64   : > { %p2847_p12 = scmp.ne.s32.totalorder %s3781_s0, %s2846_s6  ;;  %p2853_p0 = scmp.lt.u32.totalorder %s2846_s6, %s3781_s0 }
  0x66   : > { %p2849_p13 = pnand %p2848_p10, %p2847_p12 }
  0x68   : > { %p2850_p1 = pneg %p2849_p13 }
  0x6a   : > { %p2855_p3 = pnand %p2853_p0, %p2850_p1 }
  0x6c   : > { %2858 = shalt.err (!%p2855_p3)
}
  0x6d   : > { %s2859_s15 = scalar_lea.vmem %s428_s22, 256  ;;  %p2867_p5 = scmp.lt.s32.totalorder %s428_s22, %s428_s22 }
  0x6e   : > { %p2860_p4 = scmp.ne.s32.totalorder %s428_s22, %s2859_s15  ;;  %p2868_p7 = scmp.lt.s32.totalorder %s2859_s15, %s2859_s15 }
  0x70   : > { %p2862_p9 = pnand %p2860_p4, %p2848_p10  ;;  %p2869_p2 = por %p2868_p7, %p2867_p5 }
  0x72   : > { %p2863_p6 = pneg %p2862_p9 }
  0x74   : > { %p2870_p8 = pnand %p2869_p2, %p2863_p6 }
  0x76   : > { %2873 = shalt.err (!%p2870_p8)
}
  0x77   : > { %s3027_s10 = smov 128   ;;  %s3028_s30 = smov 8  }
  0x78   : > { %2648 = dma.hbm_to_vmem [thread:$0]  (!%p3265_p11), %s3781_s0, 256, %s428_s22, [#allocation8], %s3027_s10, %s3027_s10, %s3028_s30  }
  0x79   : > { %s2874_s20 = scalar_lea.hbm %s3273_s29, 16  ;;  %p3782_p10 = scmp.ne.s32.totalorder %s3774_s21, 0 }
  0x7a   : > { %p2875_p12 = scmp.ne.s32.totalorder %s3273_s29, %s2874_s20  ;;  %s2879_s15 = scalar_lea.hbm %s3734_s5, 32 }
  0x7b   : > { %p2880_p8 = scmp.lt.u32.totalorder %s3273_s29, %s3734_s5  ;;  %p2881_p2 = scmp.lt.u32.totalorder %s2879_s15, %s2874_s20 }
  0x7c   : > { %p2877_p13 = pnand %p2875_p12, %p3782_p10  ;;  %p2883_p7 = scmp.lt.u32.totalorder %s2874_s20, %s3273_s29 }
  0x7d   : > { %p2882_p6 = por %p2881_p2, %p2880_p8 }
  0x7e   : > { %p2878_p5 = pneg %p2877_p13 }
  0x7f   : > { %p2884_p1 = por %p2883_p7, %p2882_p6 }
  0x81   : > { %p2885_p0 = pnand %p2884_p1, %p2878_p5 }
  0x83   : > { %2888 = shalt.err (!%p2885_p0)
}
  0x84   : > { %s2889_s22 = scalar_lea.vmem %s3276_s24, 16  ;;  %s3029_s25 = smov [#allocation12]  }
  0x85   : > { %p2890_p11 = scmp.ne.s32.totalorder %s3276_s24, %s2889_s22  ;;  %s2894_s10 = sshll.u32 %s3029_s25, 4  ;;  %s2895_s10 = int_to_ptr.vmem [resolvable:$false] %s2894_s10 }
  0x86   : > { %s2896_s7 = scalar_lea.vmem %s2895_s10, 32  ;;  %p2897_p9 = scmp.lt.s32.totalorder %s3276_s24, %s2895_s10 }
  0x87   : > { %p2892_p3 = pnand %p2890_p11, %p3782_p10  ;;  %p2898_p12 = scmp.lt.s32.totalorder %s2896_s7, %s2889_s22 }
  0x89   : > { %p2893_p4 = pneg %p2892_p3  ;;  %p2899_p13 = por %p2898_p12, %p2897_p9 }
  0x8b   : > { %p2900_p8 = pnand %p2899_p13, %p2893_p4 }
  0x8d   : > { %2903 = shalt.err (!%p2900_p8)
}
  0x8e   : > { %p3783_p5 = scmp.ne.s32.totalorder %s3772_s16, 0  ;;  %s3320_s6 = scalar_lea.hbm %s3737_s8, %s3164_s19 }
  0x8f   : > { %s525_s17 = scalar_lea.vmem [#allocation15], %s3161_s18  ;;  %s2904_s23 = scalar_lea.hbm %s3320_s6, 16 }
  0x90   : > { %2655 = dma.hbm_to_vmem [thread:$0]  (!%p3783_p5), %s3273_s29, 16, %s3276_s24, %s3184_s14  }
  0x91   : > { %s532_s20 = sshll.u32 %s525_s17, 4  ;;  %p2905_p2 = scmp.ne.s32.totalorder %s3320_s6, %s2904_s23  ;;  %s533_s20 = int_to_ptr.vmem [resolvable:$true] %s532_s20 }
  0x92   : > { %s2909_s14 = scalar_lea.hbm %s3737_s8, 32  ;;  %p2910_p1 = scmp.lt.u32.totalorder %s3320_s6, %s3737_s8 }
  0x93   : > { %p2907_p6 = pnand %p2905_p2, %p3782_p10  ;;  %p2911_p0 = scmp.lt.u32.totalorder %s2909_s14, %s2904_s23 }
  0x94   : > { %p2913_p3 = scmp.lt.u32.totalorder %s2904_s23, %s3320_s6 }
  0x95   : > { %p2908_p7 = pneg %p2907_p6  ;;  %p2912_p11 = por %p2911_p0, %p2910_p1 }
  0x97   : > { %p2914_p4 = por %p2913_p3, %p2912_p11 }
  0x99   : > { %p2915_p9 = pnand %p2914_p4, %p2908_p7 }
  0x9b   : > { %2918 = shalt.err (!%p2915_p9)
}
  0x9c   : > { %s2919_s18 = scalar_lea.vmem %s533_s20, 16  ;;  %s3030_s19 = smov [#allocation15]  }
  0x9d   : > { %p2920_p12 = scmp.ne.s32.totalorder %s533_s20, %s2919_s18  ;;  %s2924_s22 = sshll.u32 %s3030_s19, 4  ;;  %s2925_s22 = int_to_ptr.vmem [resolvable:$false] %s2924_s22 }
  0x9e   : > { %s2926_s25 = scalar_lea.vmem %s2925_s22, 32  ;;  %p2927_p2 = scmp.lt.s32.totalorder %s533_s20, %s2925_s22 }
  0x9f   : > { %p2922_p13 = pnand %p2920_p12, %p3782_p10  ;;  %p2928_p6 = scmp.lt.s32.totalorder %s2926_s25, %s2919_s18 }
  0xa1   : > { %p2923_p8 = pneg %p2922_p13  ;;  %p2929_p5 = por %p2928_p6, %p2927_p2 }
  0xa3   : > { %p2930_p0 = pnand %p2929_p5, %p2923_p8 }
  0xa5   : > { %2933 = shalt.err (!%p2930_p0)
}
  0xa6   : > { %p3784_p1 = scmp.ne.s32.totalorder %s3772_s16, 0  ;;  %p3785_p7 = scmp.ne.s32.totalorder %s3779_s12, 0 }
  0xa7   : > { %p3786_p10 = scmp.eq.s32.totalorder (!%p3785_p7), %s3244_s4, 0 }
  0xa8   : > { %2661 = dma.hbm_to_vmem [thread:$0]  (!%p3784_p1), %s3320_s6, 16, %s533_s20, %s3223_s13  }
  0xa9   : > { %567 = sbr.rel (%p3785_p7) target bundleno = 2818 (0xb02), region = 72 }
  0xb0   : > { %2985 = dma.done.wait (%p3786_p10), [#allocation8], 256   ;;  %p3787_p11 = pmov %p3786_p10 }
  0xb1   : > { %s573_s21 = sand.u32 1, %s3244_s4   ;;  %s3349_s10 = sand.u32 1, %s3006_s26  }
  0xb2   : > { %2987 = vsyncadd (%p3787_p11), [#allocation8], 4294967040  ;;  %s574_s16 = scalar_lea.sflag [#allocation11], %s573_s21  ;;  %p3788_p5 = scmp.ne.s32.totalorder %s3778_s11, 0 }
  0xb4   : > { %2989 = dma.done.wait (%p3788_p5), %s574_s16, 32  }
  0xb5   : > { %2991 = vsyncadd (%p3788_p5), %s574_s16, 4294967264  ;;  %s590_s12 = scalar_lea.sflag [#allocation14], %s573_s21 }
  0xb6   : > { %2993 = dma.done.wait (%p3788_p5), %s590_s12, 32  }
  0xb7   : > { %2995 = vsyncadd (%p3788_p5), %s590_s12, 4294967264  ;;  %p682_p3 = scmp.lt.s32.totalorder %s3014_s28, 1  ;;  %s3789_s1 = sld [smem:[#allocation27_spill]] }
  0xb8   : > { %s3790_s3 = sld [smem:[#allocation28_spill]]  ;;  %s3791_s22 = sld [smem:[#allocation31_spill]] }
  0xb9   : > { %s3364_s30 = scalar_select %p682_p3, %s3014_s28, 1 }
  0xba   : > { %s3792_s9 = sld [smem:[#allocation32_spill]]  ;;  %s3793_s27 = sld [smem:[#allocation33_spill]] }
  0xbb   : > { %s2445_s6 = sshll.u32 %s3364_s30, 4  ;;  %s2448_s21 = sshll.u32 %s3364_s30, 5 }
  0xbc   : > { %s3794_s14 = sld [smem:[#allocation34_spill]]  ;;  %p2399_p4 = scmp.ne.s32.totalorder %s3014_s28, 0 }
  0xbd   : > { %s686_s15 = scalar_lea.vmem %s3789_s1, %s2445_s6  ;;  %v720_v0 = vld [vmem:[#allocation7] sm:$0xff] (!%p2399_p4)  ;;  %vm722_vm0 = vcmask (!%p2399_p4), 261120   ;;  %v721_v1 = vld [vmem:[#allocation7 + $0x8] sm:$0xff] (!%p2399_p4) }
  0xbe   : > { %s3377_s24 = scalar_lea.vmem %s3790_s3, %s2445_s6  ;;  %s3382_s25 = scalar_lea.vmem %s3791_s22, %s2445_s6  ;;  %723 = vst.msk [vmem:[#allocation2] sm:$0xff] (!%p2399_p4), %vm722_vm0, %v720_v0  ;;  %724 = vst.msk [vmem:[#allocation2 + $0x8] sm:$0xff] (!%p2399_p4), %vm722_vm0, %v721_v1 }
  0xbf   : > { %s3795_s3 = sld [smem:[#allocation35_spill]]  ;;  %s600_s6 = scalar_lea.vmem [#allocation15], %s3349_s10 }
  0xc0   : > { %s3388_s17 = scalar_lea.vmem %s3792_s9, %s2448_s21  ;;  %s707_s11 = scalar_lea.vmem %s3793_s27, %s3364_s30 }
  0xc1   : > { %719 = sbr.rel (%p2399_p4) target bundleno = 200 (0xc8), region = 96 }
  0xc2   : > { %s710_s29 = scalar_lea.vmem %s3794_s14, %s3364_s30 }
  0xc5   : > { %s713_s18 = scalar_lea.vmem %s3795_s3, %s3364_s30 }
  0xc8 PF: > { %v2736_v2 = vld [vmem:[%s686_s15] sm:$0xff]   ;;  %v3031_v3 = vmov 0.0   ;;  %v2737_v4 = vld [vmem:[%s686_s15 + $0x8] sm:$0xff]   ;;  %vm3032_vm1 = vmmov 0   ;;  %vm751_vm2 = vcmask 261120   ;;  %s3796_s3 = scalar_lea.vmem %s3731_s2, %s3364_s30  ;;  %vm797_vm3 = vcmask 60416  }
  0xc9   : > { %2497 = vmatprep.subr.bf16.mxu0 %v3031_v3  ;;  %2505 = vmatprep.subr.bf16.mxu1 %v3031_v3  ;;  %v3408_v5 = vld [vmem:[#allocation2] sm:$0xff]  ;;  %v3410_v6 = vld [vmem:[#allocation2 + $0x8] sm:$0xff]  ;;  %s3033_s7 = smov 80   ;;  %s3034_s13 = smov 96   ;;  %vm940_vm4 = vcmask 64512   ;;  %vm1416_vm5 = vcmask 1043456  }
  0xca   : > { %2498 = vmatpush3.bf16.msra.mxu0 %v2736_v2  ;;  %2501 = vmatprep.mubr.msk.bf16.mxu0 %vm3032_vm1, %v3031_v3  ;;  %v727_v7 = vpack.c.bf16 %v3410_v6, %v3408_v5  ;;  %v2400_v8 = vld [vmem:[%s3796_s3] ss:$0 sm:$0xff]  ;;  %s3035_s9 = smov 120   ;;  %s3036_s23 = smov 88   ;;  %vm1809_vm6 = vcmask 64516   ;;  %vm1789_vm7 = vcmask 126016  }
  0xcb   : > { %2499 = vmatprep.subr.bf16.mxu0 %v3031_v3  ;;  %2507 = vmatprep.mubr.msk.bf16.mxu1 %vm3032_vm1, %v3031_v3  ;;  %s3037_s15 = smov 112   ;;  %s3038_s19 = smov 72   ;;  %vm1796_vm8 = vcmask 191616   ;;  %vm1803_vm9 = vcmask 257216   ;;  %vm1817_vm10 = vcmask 130116   ;;  %vm1825_vm11 = vcmask 195716  }
  0xcc   : > { %s3039_s22 = smov 104   ;;  %s3040_s21 = smov 64   ;;  %vm1833_vm12 = vcmask 261316   ;;  %vm2060_vm13 = vcmask 523264  }
  0xcd   : > { %s3041_s16 = smov 56   ;;  %s3042_s12 = smov 40  }
  0xce   : > { %2500 = vmatpush3.bf16.msra.mxu0 %v2737_v4  ;;  %s3043_s20 = smov 48   ;;  %s3044_s27 = smov 8  }
  0xcf   : > { %2511 = vmatprep.subr.bf16.mxu0 %v3031_v3  ;;  %s3045_s14 = smov 16   ;;  %s3046_s0 = smov 24  }
  0xd0   : > { %s3799_s1 = scalar_lea.vmem [#allocation13], %s3349_s10  ;;  %p2440_p9 = scmp.ne.s32.totalorder %s3014_s28, 1 }
  0xd1   : > { %2502 = vmatmul.mubr.msk.bf16.vlgmr.msra.gmra.mrb[0].mxu0 %vm751_vm2, %v727_v7 }
  0xd2   : > { %2513 = vmatprep.mubr.msk.bf16.mxu0 %vm3032_vm1, %v3031_v3 }
 0x1a4   : > { %v789_v9 = vpop.f32.mrb[0].mxu0 }
 0x1a5   : > { %v790_v10 = vadd.f32 %v2400_v8, %v789_v9  ;;  %v2503_v11 = vpop.f32.mrb[1].mxu0 }
 0x1a6   : > { %v792_v12 = vpop.f32.mrb[2].mxu0 }
 0x1a7   : > { %v3426_v13 = vpack.c.bf16 %v790_v10, %v790_v10  ;;  %v793_v14 = vadd.f32 %v2400_v8, %v792_v12  ;;  %v2504_v15 = vpop.f32.mrb[3].mxu0 }
 0x1a9   : > { %v3428_v16 = vpack.c.bf16 %v793_v14, %v793_v14  ;;  %830 = vrot.lane.b32.xlu1 %v3426_v13, %s3033_s7  ;;  %802 = vrot.lane.b32.xlu0 %v3426_v13, %s3034_s13  ;;  %798 = vst.msk [vmem:[#allocation3] sm:$0xf] %vm797_vm3, %v3426_v13 }
 0x1ab   : > { %857 = vst.msk [vmem:[#allocation3 + $0x10] sm:$0xf] %vm797_vm3, %v3428_v16 }
 0x1ad   : > { %810 = vrot.lane.b32.xlu1 %v3426_v13, %s3035_s9  ;;  %815 = vrot.lane.b32.xlu0 %v3426_v13, %s3036_s23 }
 0x1b0   : > { %v916_v32 = vld [vmem:[#allocation3] sm:$0xf] }
 0x1b1   : > { %825 = vrot.lane.b32.xlu1 %v3426_v13, %s3037_s15  ;;  %845 = vrot.lane.b32.xlu0 %v3426_v13, %s3038_s19 }
 0x1b2   : > { %v920_v49 = vld [vmem:[#allocation3 + $0x10] sm:$0xf] }
 0x1b5   : > { %840 = vrot.lane.b32.xlu1 %v3426_v13, %s3039_s22  ;;  %861 = vrot.lane.b32.xlu0 %v3428_v16, %s3034_s13 }
 0x1b9   : > { %891 = vrot.lane.b32.xlu1 %v3428_v16, %s3033_s7  ;;  %876 = vrot.lane.b32.xlu0 %v3428_v16, %s3036_s23 }
 0x1bd   : > { %906 = vrot.lane.b32.xlu1 %v3428_v16, %s3038_s19  ;;  %871 = vrot.lane.b32.xlu0 %v3428_v16, %s3035_s9 }
 0x1c1   : > { %901 = vrot.lane.b32.xlu1 %v3428_v16, %s3039_s22  ;;  %886 = vrot.lane.b32.xlu0 %v3428_v16, %s3037_s15 }
 0x1c5   : > { %806 = vrot.lane.b32.xlu0 %v3426_v13, %s3040_s21 }
 0x21b   : > { %v831_v17 = vpop.permute.xlu1 %830  ;;  %v803_v18 = vpop.permute.xlu0 %802 }
 0x21c   : > { %834 = vst.msk [vmem:[#allocation4 + $0x8] sm:$0xf] %vm797_vm3, %v831_v17  ;;  %805 = vst.msk [vmem:[#allocation4] sm:$0xf] %vm797_vm3, %v803_v18 }
 0x21f   : > { %v811_v19 = vpop.permute.xlu1 %810  ;;  %v816_v20 = vpop.permute.xlu0 %815 }
 0x220   : > { %814 = vst.msk [vmem:[#allocation3 + $0x4] sm:$0xf] %vm797_vm3, %v811_v19  ;;  %819 = vst.msk [vmem:[#allocation4 + $0x4] sm:$0xf] %vm797_vm3, %v816_v20 }
 0x223   : > { %v826_v21 = vpop.permute.xlu1 %825  ;;  %v846_v22 = vpop.permute.xlu0 %845  ;;  %v924_v23 = vld [vmem:[#allocation4] sm:$0xf]  ;;  %v926_v29 = vld [vmem:[#allocation4 + $0x8] sm:$0xf] }
 0x224   : > { %829 = vst.msk [vmem:[#allocation3 + $0x8] sm:$0xf] %vm797_vm3, %v826_v21  ;;  %849 = vst.msk [vmem:[#allocation4 + $0xc] sm:$0xf] %vm797_vm3, %v846_v22  ;;  %v945_v24 = vsel %vm940_vm4, %v924_v23, 0  ;;  %v1037_v33 = vsel %vm940_vm4, %v926_v29, 0 }
 0x225   : > { %2506 = vmatpush3.bf16.xpose.msra.mxu1 %v945_v24 }
 0x226   : > { %2517 = vmatprep.subr.bf16.mxu1 %v3031_v3 }
 0x227   : > { %v841_v25 = vpop.permute.xlu1 %840  ;;  %v862_v26 = vpop.permute.xlu0 %861  ;;  %v925_v27 = vld [vmem:[#allocation4 + $0x4] sm:$0xf] }
 0x228   : > { %844 = vst.msk [vmem:[#allocation3 + $0xc] sm:$0xf] %vm797_vm3, %v841_v25  ;;  %865 = vst.msk [vmem:[#allocation4 + $0x10] sm:$0xf] %vm797_vm3, %v862_v26  ;;  %v991_v28 = vsel %vm940_vm4, %v925_v27, 0 }
 0x229   : > { %2512 = vmatpush3.bf16.xpose.msra.mxu0 %v991_v28  ;;  %v917_v37 = vld [vmem:[#allocation3 + $0x4] sm:$0xf] }
 0x22a   : > { %2523 = vmatprep.subr.bf16.mxu0 %v3031_v3 }
 0x22b   : > { %v892_v30 = vpop.permute.xlu1 %891  ;;  %v877_v31 = vpop.permute.xlu0 %876  ;;  %v927_v34 = vld [vmem:[#allocation4 + $0xc] sm:$0xf]  ;;  %v918_v42 = vld [vmem:[#allocation3 + $0x8] sm:$0xf] }
 0x22c   : > { %895 = vst.msk [vmem:[#allocation4 + $0x18] sm:$0xf] %vm797_vm3, %v892_v30  ;;  %880 = vst.msk [vmem:[#allocation4 + $0x14] sm:$0xf] %vm797_vm3, %v877_v31  ;;  %2508 = vmatmul.mubr.msk.bf16.vlgmr.msra.gmra.mrb[0].mxu1 %vm940_vm4, %v916_v32  ;;  %v1083_v38 = vsel %vm940_vm4, %v927_v34, 0 }
 0x22d   : > { %2518 = vmatpush3.bf16.xpose.msra.mxu1 %v1037_v33  ;;  %2519 = vmatprep.mubr.msk.bf16.mxu1 %vm3032_vm1, %v3031_v3 }
 0x22e   : > { %2529 = vmatprep.subr.bf16.mxu1 %v3031_v3 }
 0x22f   : > { %v907_v35 = vpop.permute.xlu1 %906  ;;  %v872_v36 = vpop.permute.xlu0 %871  ;;  %v928_v39 = vld [vmem:[#allocation4 + $0x10] sm:$0xf]  ;;  %v919_v46 = vld [vmem:[#allocation3 + $0xc] sm:$0xf] }
 0x230   : > { %910 = vst.msk [vmem:[#allocation4 + $0x1c] sm:$0xf] %vm797_vm3, %v907_v35  ;;  %875 = vst.msk [vmem:[#allocation3 + $0x14] sm:$0xf] %vm797_vm3, %v872_v36  ;;  %2514 = vmatmul.mubr.msk.bf16.vlgmr.msra.gmra.mrb[4].mxu0 %vm940_vm4, %v917_v37  ;;  %v1129_v43 = vsel %vm940_vm4, %v928_v39, 0 }
 0x231   : > { %2524 = vmatpush3.bf16.xpose.msra.mxu0 %v1083_v38  ;;  %2525 = vmatprep.mubr.msk.bf16.mxu0 %vm3032_vm1, %v3031_v3 }
 0x232   : > { %2535 = vmatprep.subr.bf16.mxu0 %v3031_v3 }
 0x233   : > { %v902_v40 = vpop.permute.xlu1 %901  ;;  %v887_v41 = vpop.permute.xlu0 %886  ;;  %v929_v44 = vld [vmem:[#allocation4 + $0x14] sm:$0xf]  ;;  %v930_v48 = vld [vmem:[#allocation4 + $0x18] sm:$0xf] }
 0x234   : > { %905 = vst.msk [vmem:[#allocation3 + $0x1c] sm:$0xf] %vm797_vm3, %v902_v40  ;;  %890 = vst.msk [vmem:[#allocation3 + $0x18] sm:$0xf] %vm797_vm3, %v887_v41  ;;  %2520 = vmatmul.mubr.msk.bf16.vlgmr.msra.gmra.mrb[4].mxu1 %vm940_vm4, %v918_v42  ;;  %v1175_v47 = vsel %vm940_vm4, %v929_v44, 0  ;;  %v1221_v50 = vsel %vm940_vm4, %v930_v48, 0 }
 0x235   : > { %2530 = vmatpush3.bf16.xpose.msra.mxu1 %v1129_v43  ;;  %2531 = vmatprep.mubr.msk.bf16.mxu1 %vm3032_vm1, %v3031_v3 }
 0x236   : > { %2541 = vmatprep.subr.bf16.mxu1 %v3031_v3 }
 0x237   : > { %v807_v45 = vpop.permute.xlu0 %806  ;;  %v931_v51 = vld [vmem:[#allocation4 + $0x1c] sm:$0xf]  ;;  %v921_v52 = vld [vmem:[#allocation3 + $0x14] sm:$0xf] }
 0x238   : > { %809 = vst.msk [vmem:[#allocation5] sm:$0xf] %vm797_vm3, %v807_v45  ;;  %2526 = vmatmul.mubr.msk.bf16.vlgmr.msra.gmra.mrb[8].mxu0 %vm940_vm4, %v919_v46  ;;  %v1267_v53 = vsel %vm940_vm4, %v931_v51, 0 }
 0x239   : > { %2536 = vmatpush3.bf16.xpose.msra.mxu0 %v1175_v47  ;;  %2537 = vmatprep.mubr.msk.bf16.mxu0 %vm3032_vm1, %v3031_v3 }
 0x23a   : > { %2547 = vmatprep.subr.bf16.mxu0 %v3031_v3 }
 0x23b   : > { %v922_v55 = vld [vmem:[#allocation3 + $0x18] sm:$0xf]  ;;  %v923_v57 = vld [vmem:[#allocation3 + $0x1c] sm:$0xf] }
 0x23c   : > { %2532 = vmatmul.mubr.msk.bf16.vlgmr.msra.gmra.mrb[8].mxu1 %vm940_vm4, %v920_v49 }
 0x23d   : > { %2542 = vmatpush3.bf16.xpose.msra.mxu1 %v1221_v50  ;;  %2543 = vmatprep.mubr.msk.bf16.mxu1 %vm3032_vm1, %v3031_v3 }
 0x23e   : > { %2553 = vmatprep.subr.bf16.mxu1 %v3031_v3 }
 0x23f   : > { %v932_v54 = vld [vmem:[#allocation5] sm:$0xf] }
 0x240   : > { %2538 = vmatmul.mubr.msk.bf16.vlgmr.msra.gmra.mrb[12].mxu0 %vm940_vm4, %v921_v52  ;;  %v1418_v56 = vsel %vm1416_vm5, %v932_v54, 0 }
 0x241   : > { %2548 = vmatpush3.bf16.xpose.msra.mxu0 %v1267_v53  ;;  %2549 = vmatprep.mubr.msk.bf16.mxu0 %vm3032_vm1, %v3031_v3 }
 0x242   : > { %2559 = vmatprep.subr.bf16.mxu0 %v3031_v3 }
 0x244   : > { %2544 = vmatmul.mubr.msk.bf16.vlgmr.msra.gmra.mrb[12].mxu1 %vm940_vm4, %v922_v55 }
 0x245   : > { %2554 = vmatpush3.bf16.msra.mxu1 %v1418_v56  ;;  %2555 = vmatprep.mubr.msk.bf16.mxu1 %vm3032_vm1, %v3031_v3 }
 0x246   : > { %2565 = vmatprep.subr.bf16.mxu1 %v3031_v3 }
 0x248   : > { %2550 = vmatmul.mubr.msk.bf16.vlgmr.msra.gmra.mrb[16].mxu0 %vm940_vm4, %v923_v57 }
 0x249   : > { %2561 = vmatprep.mubr.msk.bf16.mxu0 %vm3032_vm1, %v3031_v3 }
 0x2ff   : > { %v981_v58 = vpop.f32.mrb[0].mxu1 }
 0x300   : > { %v3507_v59 = vmul.f32 0.35355338, %v981_v58  ;;  %v2509_v60 = vpop.f32.mrb[1].mxu1 }
 0x301   : > { %v984_v61 = vpop.f32.mrb[2].mxu1 }
 0x302   : > { %v2510_v62 = vpop.f32.mrb[3].mxu1  ;;  %v1317_v63 = vsel %vm940_vm4, %v3507_v59, -inf }
 0x303   : > { %1318 = vmax.xlane.f32.xlu0 %v1317_v63  ;;  %v1027_v0 = vpop.f32.mrb[4].mxu0 }
 0x304   : > { %v1310_v1 = vmul.f32 0.35355338, %v1027_v0  ;;  %v2515_v2 = vpop.f32.mrb[5].mxu0 }
 0x305   : > { %v1030_v4 = vpop.f32.mrb[6].mxu0 }
 0x306   : > { %v2516_v7 = vpop.f32.mrb[7].mxu0  ;;  %v1320_v8 = vsel %vm940_vm4, %v1310_v1, -inf }
 0x307   : > { %v1073_v9 = vpop.f32.mrb[4].mxu1  ;;  %1321 = vmax.xlane.f32.xlu1 %v1320_v8 }
 0x308   : > { %v1311_v10 = vmul.f32 0.35355338, %v1073_v9  ;;  %v2521_v11 = vpop.f32.mrb[5].mxu1 }
 0x309   : > { %v1076_v12 = vpop.f32.mrb[6].mxu1 }
 0x30a   : > { %v2522_v14 = vpop.f32.mrb[7].mxu1  ;;  %v1323_v15 = vsel %vm940_vm4, %v1311_v10, -inf }
 0x30b   : > { %1324 = vmax.xlane.f32.xlu0 %v1323_v15  ;;  %v1119_v17 = vpop.f32.mrb[8].mxu0 }
 0x30c   : > { %v3513_v18 = vmul.f32 0.35355338, %v1119_v17  ;;  %v2527_v19 = vpop.f32.mrb[9].mxu0 }
 0x30d   : > { %v1122_v20 = vpop.f32.mrb[10].mxu0 }
 0x30e   : > { %v2528_v21 = vpop.f32.mrb[11].mxu0  ;;  %v1326_v22 = vsel %vm940_vm4, %v3513_v18, -inf }
 0x30f   : > { %v1165_v23 = vpop.f32.mrb[8].mxu1  ;;  %1327 = vmax.xlane.f32.xlu0 %v1326_v22 }
 0x310   : > { %v1313_v24 = vmul.f32 0.35355338, %v1165_v23  ;;  %v2533_v25 = vpop.f32.mrb[9].mxu1 }
 0x311   : > { %v1168_v26 = vpop.f32.mrb[10].mxu1 }
 0x312   : > { %v2534_v27 = vpop.f32.mrb[11].mxu1  ;;  %v1329_v28 = vsel %vm940_vm4, %v1313_v24, -inf }
 0x313   : > { %1330 = vmax.xlane.f32.xlu1 %v1329_v28  ;;  %v1211_v29 = vpop.f32.mrb[12].mxu0 }
 0x314   : > { %v1314_v30 = vmul.f32 0.35355338, %v1211_v29  ;;  %v2539_v31 = vpop.f32.mrb[13].mxu0 }
 0x315   : > { %v1214_v32 = vpop.f32.mrb[14].mxu0 }
 0x316   : > { %v2540_v33 = vpop.f32.mrb[15].mxu0  ;;  %v1332_v34 = vsel %vm940_vm4, %v1314_v30, -inf }
 0x317   : > { %v1257_v35 = vpop.f32.mrb[12].mxu1  ;;  %1333 = vmax.xlane.f32.xlu0 %v1332_v34 }
 0x318   : > { %v2545_v36 = vpop.f32.mrb[13].mxu1  ;;  %v3524_v45 = vmul.f32 0.35355338, %v1257_v35 }
 0x319   : > { %v1260_v37 = vpop.f32.mrb[14].mxu1 }
 0x31a   : > { %v2546_v38 = vpop.f32.mrb[15].mxu1  ;;  %v1335_v46 = vsel %vm940_vm4, %v3524_v45, -inf }
 0x31b   : > { %v1303_v39 = vpop.f32.mrb[16].mxu0 }
 0x31c   : > { %v1316_v40 = vmul.f32 0.35355338, %v1303_v39  ;;  %v2551_v41 = vpop.f32.mrb[17].mxu0 }
 0x31d   : > { %v1306_v42 = vpop.f32.mrb[18].mxu0 }
 0x31e   : > { %v2552_v43 = vpop.f32.mrb[19].mxu0  ;;  %v1338_v44 = vsel %vm940_vm4, %v1316_v40, -inf }
 0x31f   : > { %1339 = vmax.xlane.f32.xlu0 %v1338_v44 }
 0x324   : > { %820 = vrot.lane.b32.xlu1 %v3426_v13, %s3041_s16 }
 0x335   : > { %850 = vrot.lane.b32.xlu0 %v3426_v13, %s3042_s12 }
 0x348   : > { %1336 = vmax.xlane.f32.xlu1 %v1335_v46 }
 0x359   : > { %835 = vrot.lane.b32.xlu1 %v3426_v13, %s3043_s20 }
 0x35d   : > { %866 = vrot.lane.b32.xlu1 %v3428_v16, %s3040_s21 }
 0x390   : > { %v1319_v47 = vpop.xlane.xlu0 %1318 }
 0x391   : > { %v1341_v48 = vsub.f32 %v3507_v59, %v1319_v47 }
 0x393   : > { %v1349_v49 = vmul.f32 1.442695, %v1341_v48 }
 0x394   : > { %v1322_v50 = vpop.xlane.xlu1 %1321 }
 0x395   : > { %2746 = vpow2.f32 %v1349_v49  ;;  %v1342_v51 = vsub.f32 %v1310_v1, %v1322_v50 }
 0x397   : > { %v1351_v52 = vmul.f32 1.442695, %v1342_v51 }
 0x398   : > { %v1325_v53 = vpop.xlane.xlu0 %1324 }
 0x399   : > { %2748 = vpow2.f32 %v1351_v52  ;;  %v1343_v54 = vsub.f32 %v1311_v10, %v1325_v53 }
 0x39b   : > { %v1353_v55 = vmul.f32 1.442695, %v1343_v54 }
 0x39c   : > { %v1328_v57 = vpop.xlane.xlu0 %1327 }
 0x39d   : > { %2750 = vpow2.f32 %v1353_v55  ;;  %v1344_v23 = vsub.f32 %v3513_v18, %v1328_v57 }
 0x39f   : > { %v3533_v56 = vpop.eup %2746 }
 0x3a0   : > { %v1331_v13 = vpop.xlane.xlu1 %1330  ;;  %v1365_v58 = vsel %vm940_vm4, %v3533_v56, 0.0 }
 0x3a1   : > { %v1345_v60 = vsub.f32 %v1313_v24, %v1331_v13  ;;  %1366 = vadd.xlane.f32.xlu1 %v1365_v58  ;;  %v1355_v24 = vmul.f32 1.442695, %v1344_v23 }
 0x3a3   : > { %v3537_v59 = vpop.eup %2748  ;;  %v1357_v61 = vmul.f32 1.442695, %v1345_v60 }
 0x3a4   : > { %v821_v62 = vpop.permute.xlu1 %820  ;;  %v1334_v63 = vpop.xlane.xlu0 %1333  ;;  %v1368_v0 = vsel %vm940_vm4, %v3537_v59, 0.0 }
 0x3a5   : > { %2752 = vpow2.f32 %v1357_v61  ;;  %824 = vst.msk [vmem:[#allocation5 + $0x4] sm:$0xf] %vm797_vm3, %v821_v62  ;;  %v1346_v1 = vsub.f32 %v1314_v30, %v1334_v63  ;;  %1369 = vadd.xlane.f32.xlu0 %v1368_v0 }
 0x3a7   : > { %v3542_v2 = vpop.eup %2750  ;;  %v1359_v4 = vmul.f32 1.442695, %v1346_v1 }
 0x3a8   : > { %v1371_v7 = vsel %vm940_vm4, %v3542_v2, 0.0 }
 0x3a9   : > { %2754 = vpow2.f32 %v1359_v4  ;;  %1372 = vadd.xlane.f32.xlu1 %v1371_v7 }
 0x3ac   : > { %v1340_v8 = vpop.xlane.xlu0 %1339  ;;  %v933_v9 = vld [vmem:[#allocation5 + $0x4] sm:$0xf] }
 0x3ad   : > { %v1348_v10 = vsub.f32 %v1316_v40, %v1340_v8  ;;  %v1464_v11 = vsel %vm1416_vm5, %v933_v9, 0 }
 0x3ae   : > { %2560 = vmatpush3.bf16.msra.mxu0 %v1464_v11 }
 0x3af   : > { %v3547_v12 = vpop.eup %2752  ;;  %v1363_v14 = vmul.f32 1.442695, %v1348_v10  ;;  %2571 = vmatprep.subr.bf16.mxu0 %v3031_v3 }
 0x3b0   : > { %v851_v15 = vpop.permute.xlu0 %850  ;;  %v1377_v17 = vsel %vm940_vm4, %v3547_v12, 0.0 }
 0x3b1   : > { %2756 = vpow2.f32 %v1363_v14  ;;  %854 = vst.msk [vmem:[#allocation5 + $0xc] sm:$0xf] %vm797_vm3, %v851_v15  ;;  %1378 = vadd.xlane.f32.xlu1 %v1377_v17 }
 0x3b2   : > { %2758 = vpow2.f32 %v1355_v24 }
 0x3b3   : > { %v3553_v19 = vpop.eup %2754 }
 0x3b4   : > { %v1380_v20 = vsel %vm940_vm4, %v3553_v19, 0.0 }
 0x3b5   : > { %1381 = vadd.xlane.f32.xlu1 %v1380_v20 }
 0x3b8   : > { %v935_v44 = vld [vmem:[#allocation5 + $0xc] sm:$0xf] }
 0x3b9   : > { %v1556_v48 = vsel %vm1416_vm5, %v935_v44, 0 }
 0x3bb   : > { %v3557_v21 = vpop.eup %2756  ;;  %881 = vrot.lane.b32.xlu0 %v3428_v16, %s3041_s16 }
 0x3bc   : > { %v1386_v22 = vsel %vm940_vm4, %v3557_v21, 0.0  ;;  %v3566_v26 = vpop.eup %2758 }
 0x3bd   : > { %1387 = vadd.xlane.f32.xlu1 %v1386_v22  ;;  %v1374_v30 = vsel %vm940_vm4, %v3566_v26, 0.0 }
 0x3ce   : > { %911 = vrot.lane.b32.xlu1 %v3428_v16, %s3042_s12 }
 0x3d5   : > { %v1337_v25 = vpop.xlane.xlu1 %1336 }
 0x3d6   : > { %v1347_v27 = vsub.f32 %v3524_v45, %v1337_v25 }
 0x3d8   : > { %v1361_v28 = vmul.f32 1.442695, %v1347_v27 }
 0x3d9   : > { %v836_v29 = vpop.permute.xlu1 %835 }
 0x3da   : > { %2760 = vpow2.f32 %v1361_v28  ;;  %839 = vst.msk [vmem:[#allocation5 + $0x8] sm:$0xf] %vm797_vm3, %v836_v29  ;;  %1375 = vadd.xlane.f32.xlu0 %v1374_v30 }
 0x3dd   : > { %v867_v18 = vpop.permute.xlu1 %866 }
 0x3de   : > { %870 = vst.msk [vmem:[#allocation5 + $0x10] sm:$0xf] %vm797_vm3, %v867_v18 }
 0x3e1   : > { %v934_v39 = vld [vmem:[#allocation5 + $0x8] sm:$0xf] }
 0x3e4   : > { %v3573_v31 = vpop.eup %2760 }
 0x3e5   : > { %v1383_v32 = vsel %vm940_vm4, %v3573_v31, 0.0  ;;  %v936_v49 = vld [vmem:[#allocation5 + $0x10] sm:$0xf] }
 0x3e6   : > { %1384 = vadd.xlane.f32.xlu0 %v1383_v32  ;;  %v1602_v52 = vsel %vm1416_vm5, %v936_v49, 0 }
 0x3fc   : > { %896 = vrot.lane.b32.xlu0 %v3428_v16, %s3043_s20  ;;  %v1510_v16 = vsel %vm1416_vm5, %v934_v39, 0 }
 0x42e   : > { %v1367_v33 = vpop.xlane.xlu1 %1366 }
 0x42f   : > { %2762 = vrcp.f32 %v1367_v33 }
 0x432   : > { %v1370_v34 = vpop.xlane.xlu0 %1369 }
 0x433   : > { %2764 = vrcp.f32 %v1370_v34 }
 0x436   : > { %v1373_v35 = vpop.xlane.xlu1 %1372  ;;  %v882_v36 = vpop.permute.xlu0 %881 }
 0x437   : > { %2766 = vrcp.f32 %v1373_v35  ;;  %885 = vst.msk [vmem:[#allocation5 + $0x14] sm:$0xf] %vm797_vm3, %v882_v36 }
 0x439   : > { %v2763_v37 = vpop.eup %2762 }
 0x43a   : > { %v1397_v38 = vmul.f32 %v2763_v37, %v3533_v56 }
 0x43c   : > { %v1405_v40 = vpack.c.bf16 %v1397_v38, %v1397_v38 }
 0x43d   : > { %v2765_v41 = vpop.eup %2764 }
 0x43e   : > { %v1398_v42 = vmul.f32 %v2765_v41, %v3537_v59  ;;  %2556 = vmatmul.mubr.msk.bf16.vlgmr.msra.gmra.mrb[16].mxu1 %vm940_vm4, %v1405_v40  ;;  %v1379_v43 = vpop.xlane.xlu1 %1378  ;;  %v937_v61 = vld [vmem:[#allocation5 + $0x14] sm:$0xf] }
 0x43f   : > { %2566 = vmatpush3.bf16.msra.mxu1 %v1510_v16  ;;  %2768 = vrcp.f32 %v1379_v43  ;;  %2567 = vmatprep.mubr.msk.bf16.mxu1 %vm3032_vm1, %v3031_v3  ;;  %v1648_v0 = vsel %vm1416_vm5, %v937_v61, 0 }
 0x440   : > { %v1406_v45 = vpack.c.bf16 %v1398_v42, %v1398_v42  ;;  %2577 = vmatprep.subr.bf16.mxu1 %v3031_v3 }
 0x441   : > { %v2767_v46 = vpop.eup %2766 }
 0x442   : > { %v1399_v47 = vmul.f32 %v2767_v46, %v3542_v2  ;;  %2562 = vmatmul.mubr.msk.bf16.vlgmr.msra.gmra.mrb[20].mxu0 %vm940_vm4, %v1406_v45  ;;  %v1382_v51 = vpop.xlane.xlu1 %1381 }
 0x443   : > { %2572 = vmatpush3.bf16.msra.mxu0 %v1556_v48  ;;  %2573 = vmatprep.mubr.msk.bf16.mxu0 %vm3032_vm1, %v3031_v3 }
 0x444   : > { %v1407_v50 = vpack.c.bf16 %v1399_v47, %v1399_v47  ;;  %2583 = vmatprep.subr.bf16.mxu0 %v3031_v3  ;;  %v2738_v47 = vld [vmem:[%s3377_s24] sm:$0xff]  }
 0x446   : > { %2568 = vmatmul.mubr.msk.bf16.vlgmr.msra.gmra.mrb[20].mxu1 %vm940_vm4, %v1407_v50 }
 0x447   : > { %2578 = vmatpush3.bf16.msra.mxu1 %v1602_v52  ;;  %2579 = vmatprep.mubr.msk.bf16.mxu1 %vm3032_vm1, %v3031_v3 }
 0x448   : > { %2589 = vmatprep.subr.bf16.mxu1 %v3031_v3 }
 0x449   : > { %v2769_v53 = vpop.eup %2768 }
 0x44a   : > { %v1401_v54 = vmul.f32 %v2769_v53, %v3547_v12  ;;  %v1388_v55 = vpop.xlane.xlu1 %1387 }
 0x44c   : > { %v1409_v56 = vpack.c.bf16 %v1401_v54, %v1401_v54 }
 0x44e   : > { %2580 = vmatmul.mubr.msk.bf16.vlgmr.msra.gmra.mrb[24].mxu1 %vm940_vm4, %v1409_v56  ;;  %v912_v57 = vpop.permute.xlu1 %911 }
 0x44f   : > { %915 = vst.msk [vmem:[#allocation5 + $0x1c] sm:$0xf] %vm797_vm3, %v912_v57  ;;  %2591 = vmatprep.mubr.msk.bf16.mxu1 %vm3032_vm1, %v3031_v3 }
 0x456   : > { %v939_v4 = vld [vmem:[#allocation5 + $0x1c] sm:$0xf] }
 0x457   : > { %v1740_v11 = vsel %vm1416_vm5, %v939_v4, 0 }
 0x467   : > { %v1376_v13 = vpop.xlane.xlu0 %1375 }
 0x468   : > { %2770 = vrcp.f32 %v1376_v13 }
 0x469   : > { %2772 = vrcp.f32 %v1382_v51  ;;  %v2739_v51 = vld [vmem:[%s3377_s24 + $0x8] sm:$0xff]   ;;  %s3797_s24 = scalar_lea.vmem [#allocation10], %s3349_s10 }
 0x46a   : > { %2774 = vrcp.f32 %v1388_v55 }
 0x472   : > { %v2771_v58 = vpop.eup %2770 }
 0x473   : > { %v1400_v60 = vmul.f32 %v2771_v58, %v3566_v26  ;;  %v1385_v59 = vpop.xlane.xlu0 %1384  ;;  %v2773_v63 = vpop.eup %2772 }
 0x474   : > { %2776 = vrcp.f32 %v1385_v59  ;;  %v1402_v2 = vmul.f32 %v2773_v63, %v3553_v19  ;;  %v2775_v7 = vpop.eup %2774 }
 0x475   : > { %v1408_v62 = vpack.c.bf16 %v1400_v60, %v1400_v60  ;;  %v1404_v15 = vmul.f32 %v2775_v7, %v3557_v21 }
 0x476   : > { %v1410_v8 = vpack.c.bf16 %v1402_v2, %v1402_v2 }
 0x477   : > { %2574 = vmatmul.mubr.msk.bf16.vlgmr.msra.gmra.mrb[24].mxu0 %vm940_vm4, %v1408_v62  ;;  %v897_v1 = vpop.permute.xlu0 %896  ;;  %v1412_v19 = vpack.c.bf16 %v1404_v15, %v1404_v15 }
 0x478   : > { %2584 = vmatpush3.bf16.msra.mxu0 %v1648_v0  ;;  %900 = vst.msk [vmem:[#allocation5 + $0x18] sm:$0xf] %vm797_vm3, %v897_v1  ;;  %2585 = vmatprep.mubr.msk.bf16.mxu0 %vm3032_vm1, %v3031_v3 }
 0x479   : > { %2595 = vmatprep.subr.bf16.mxu0 %v3031_v3 }
 0x47e   : > { %v2777_v9 = vpop.eup %2776 }
 0x47f   : > { %v1403_v10 = vmul.f32 %v2777_v9, %v3573_v31  ;;  %2586 = vmatmul.mubr.msk.bf16.vlgmr.msra.gmra.mrb[28].mxu0 %vm940_vm4, %v1410_v8  ;;  %v938_v12 = vld [vmem:[#allocation5 + $0x18] sm:$0xf]  ;;  %v2422_v9 = vld [vmem:[%s3797_s24] ss:$0 sm:$0xff] }
 0x480   : > { %2596 = vmatpush3.bf16.msra.mxu0 %v1740_v11  ;;  %v1694_v14 = vsel %vm1416_vm5, %v938_v12, 0  ;;  %2597 = vmatprep.mubr.msk.bf16.mxu0 %vm3032_vm1, %v3031_v3 }
 0x481   : > { %2590 = vmatpush3.bf16.msra.mxu1 %v1694_v14  ;;  %v1411_v17 = vpack.c.bf16 %v1403_v10, %v1403_v10  ;;  %2609 = vmatprep.subr.bf16.mxu0 %v3031_v3 }
 0x482   : > { %2601 = vmatprep.subr.bf16.mxu1 %v3031_v3 }
 0x484   : > { %2592 = vmatmul.mubr.msk.bf16.vlgmr.msra.gmra.mrb[28].mxu1 %vm940_vm4, %v1411_v17 }
 0x485   : > { %2605 = vmatprep.mubr.msk.bf16.mxu1 %vm3032_vm1, %v3031_v3  ;;  %2602 = vmatpush3.bf16.msra.mxu1 %v2738_v47 }
 0x486   : > { %2603 = vmatprep.subr.bf16.mxu1 %v3031_v3 }
 0x487   : > { %2598 = vmatmul.mubr.msk.bf16.vlgmr.msra.gmra.mrb[32].mxu0 %vm940_vm4, %v1412_v19 }
 0x488   : > { %2613 = vmatprep.mubr.msk.bf16.mxu0 %vm3032_vm1, %v3031_v3 }
 0x489   : > { %2604 = vmatpush3.bf16.msra.mxu1 %v2739_v51  ;;  %v2745_v51 = vld [vmem:[%s3388_s17 + $0x18] sm:$0xff]  }
 0x48a   : > { %2617 = vmatprep.subr.bf16.mxu1 %v3031_v3 }
 0x511   : > { %v1454_v20 = vpop.f32.mrb[16].mxu1 }
 0x512   : > { %v1782_v22 = vpack.c.bf16 %v1454_v20, %v1454_v20  ;;  %v2557_v21 = vpop.f32.mrb[17].mxu1 }
 0x513   : > { %v1457_v23 = vpop.f32.mrb[18].mxu1 }
 0x514   : > { %1783 = vst.msk [vmem:[#allocation6] sm:$0xf] %vm797_vm3, %v1782_v22  ;;  %v2558_v24 = vpop.f32.mrb[19].mxu1 }
 0x515   : > { %v1500_v25 = vpop.f32.mrb[20].mxu0 }
 0x516   : > { %v1784_v26 = vpack.c.bf16 %v1500_v25, %v1500_v25  ;;  %v2563_v27 = vpop.f32.mrb[21].mxu0 }
 0x517   : > { %v1503_v28 = vpop.f32.mrb[22].mxu0 }
 0x518   : > { %1786 = vrot.lane.b32.xlu0 %v1784_v26, %s3044_s27  ;;  %v2564_v29 = vpop.f32.mrb[23].mxu0 }
 0x519   : > { %v1546_v30 = vpop.f32.mrb[20].mxu1 }
 0x51a   : > { %v1791_v18 = vpack.c.bf16 %v1546_v30, %v1546_v30  ;;  %v2569_v31 = vpop.f32.mrb[21].mxu1 }
 0x51b   : > { %v1549_v32 = vpop.f32.mrb[22].mxu1  ;;  %v2741_v31 = vld [vmem:[%s3382_s25 + $0x8] sm:$0xff]  }
 0x51c   : > { %v2570_v33 = vpop.f32.mrb[23].mxu1  ;;  %1793 = vrot.lane.b32.xlu0 %v1791_v18, %s3045_s14  ;;  %v2740_v18 = vld [vmem:[%s3382_s25] sm:$0xff]   ;;  %s3798_s25 = scalar_lea.vmem [#allocation12], %s3349_s10 }
 0x51d   : > { %2610 = vmatpush3.bf16.msra.mxu0 %v2740_v18  ;;  %v2742_v32 = vld [vmem:[%s3388_s17] sm:$0xff]   ;;  %v2743_v33 = vld [vmem:[%s3388_s17 + $0x8] sm:$0xff]  }
 0x51e   : > { %2611 = vmatprep.subr.bf16.mxu0 %v3031_v3  ;;  %v2439_v18 = vld [vmem:[%s713_s18] ss:$0 sm:$0xff] }
 0x521   : > { %v1638_v34 = vpop.f32.mrb[24].mxu1  ;;  %2612 = vmatpush3.bf16.msra.mxu0 %v2741_v31 }
 0x522   : > { %v1805_v35 = vpack.c.bf16 %v1638_v34, %v1638_v34  ;;  %v2581_v36 = vpop.f32.mrb[25].mxu1 }
 0x523   : > { %v1641_v37 = vpop.f32.mrb[26].mxu1 }
 0x524   : > { %v1807_v38 = vrot.slane %v1805_v35, 4  ;;  %v2582_v39 = vpop.f32.mrb[27].mxu1 }
 0x526   : > { %1810 = vst.msk [vmem:[#allocation6] sm:$0xf0] %vm1809_vm6, %v1807_v38 }
 0x54a   : > { %v1592_v40 = vpop.f32.mrb[24].mxu0 }
 0x54b   : > { %v1798_v41 = vpack.c.bf16 %v1592_v40, %v1592_v40  ;;  %v2575_v42 = vpop.f32.mrb[25].mxu0 }
 0x54c   : > { %v1595_v16 = vpop.f32.mrb[26].mxu0  ;;  %v2426_v42 = vld [vmem:[%s3798_s25] ss:$0 sm:$0xff] }
 0x54d   : > { %1800 = vrot.lane.b32.xlu0 %v1798_v41, %s3046_s0  ;;  %v2576_v43 = vpop.f32.mrb[27].mxu0 }
 0x552   : > { %v1684_v44 = vpop.f32.mrb[28].mxu0 }
 0x553   : > { %v1811_v45 = vpack.c.bf16 %v1684_v44, %v1684_v44  ;;  %v2587_v46 = vpop.f32.mrb[29].mxu0 }
 0x554   : > { %v1687_v48 = vpop.f32.mrb[30].mxu0 }
 0x555   : > { %v1813_v49 = vrot.slane %v1811_v45, 4  ;;  %v2588_v50 = vpop.f32.mrb[31].mxu0  ;;  %v2427_v45 = vld [vmem:[%s3799_s1] ss:$0 sm:$0xff] }
 0x556   : > { %v2744_v50 = vld [vmem:[%s3388_s17 + $0x10] sm:$0xff]  }
 0x557   : > { %v1730_v52 = vpop.f32.mrb[28].mxu1  ;;  %1814 = vrot.lane.b32.xlu1 %v1813_v49, %s3044_s27 }
 0x558   : > { %v1819_v53 = vpack.c.bf16 %v1730_v52, %v1730_v52  ;;  %v2593_v54 = vpop.f32.mrb[29].mxu1  ;;  %v2428_v52 = vld [vmem:[%s600_s6] ss:$0 sm:$0xff] }
 0x559   : > { %v1733_v55 = vpop.f32.mrb[30].mxu1 }
 0x55a   : > { %v1821_v56 = vrot.slane %v1819_v53, 4  ;;  %v2594_v57 = vpop.f32.mrb[31].mxu1  ;;  %v1776_v13 = vpop.f32.mrb[32].mxu0 }
 0x55b   : > { %v1827_v58 = vpack.c.bf16 %v1776_v13, %v1776_v13  ;;  %v2599_v60 = vpop.f32.mrb[33].mxu0 }
 0x55c   : > { %1822 = vrot.lane.b32.xlu1 %v1821_v56, %s3045_s14  ;;  %v1779_v59 = vpop.f32.mrb[34].mxu0 }
 0x55d   : > { %v1829_v61 = vrot.slane %v1827_v58, 4  ;;  %v2600_v62 = vpop.f32.mrb[35].mxu0 }
 0x560   : > { %1830 = vrot.lane.b32.xlu1 %v1829_v61, %s3046_s0 }
 0x58a   : > { %v1787_v63 = vpop.permute.xlu0 %1786 }
 0x58b   : > { %1790 = vst.msk [vmem:[#allocation6] sm:$0xf] %vm1789_vm7, %v1787_v63 }
 0x58e   : > { %v1794_v0 = vpop.permute.xlu0 %1793 }
 0x58f   : > { %1797 = vst.msk [vmem:[#allocation6] sm:$0xf] %vm1796_vm8, %v1794_v0 }
 0x5bf   : > { %v1801_v1 = vpop.permute.xlu0 %1800 }
 0x5c0   : > { %1804 = vst.msk [vmem:[#allocation6] sm:$0xf] %vm1803_vm9, %v1801_v1 }
 0x5c9   : > { %v1815_v2 = vpop.permute.xlu1 %1814 }
 0x5ca   : > { %1818 = vst.msk [vmem:[#allocation6] sm:$0xf0] %vm1817_vm10, %v1815_v2 }
 0x5ce   : > { %v1823_v4 = vpop.permute.xlu1 %1822 }
 0x5cf   : > { %1826 = vst.msk [vmem:[#allocation6] sm:$0xf0] %vm1825_vm11, %v1823_v4 }
 0x5d2   : > { %v1831_v7 = vpop.permute.xlu1 %1830 }
 0x5d3   : > { %1834 = vst.msk [vmem:[#allocation6] sm:$0xf0] %vm1833_vm12, %v1831_v7 }
 0x5da   : > { %v1835_v8 = vld [vmem:[#allocation6] sm:$0xff] }
 0x5db   : > { %2606 = vmatmul.mubr.msk.bf16.vlgmr.msra.gmra.mrb[32].mxu1 %vm751_vm2, %v1835_v8 }
 0x5dc   : > { %2625 = vmatprep.mubr.msk.bf16.mxu1 %vm3032_vm1, %v3031_v3  ;;  %2618 = vmatpush3.bf16.msra.mxu1 %v2742_v32 }
 0x5dd   : > { %2619 = vmatprep.subr.bf16.mxu1 %v3031_v3 }
 0x5e0   : > { %2620 = vmatpush3.bf16.msra.mxu1 %v2743_v33 }
 0x5e1   : > { %2621 = vmatprep.subr.bf16.mxu1 %v3031_v3 }
 0x5e4   : > { %2622 = vmatpush3.bf16.msra.mxu1 %v2744_v50 }
 0x5e5   : > { %2623 = vmatprep.subr.bf16.mxu1 %v3031_v3  ;;  %v2432_v3 = vld [vmem:[%s707_s11] ss:$0 sm:$0xff] }
 0x5e8   : > { %2624 = vmatpush3.bf16.msra.mxu1 %v2745_v51 }
 0x6ae   : > { %v1896_v10 = vpop.f32.mrb[32].mxu1 }
 0x6af   : > { %v1897_v11 = vadd.f32 %v2422_v9, %v1896_v10  ;;  %v2607_v12 = vpop.f32.mrb[33].mxu1 }
 0x6b0   : > { %v1899_v14 = vpop.f32.mrb[34].mxu1 }
 0x6b1   : > { %v1900_v15 = vadd.f32 %v2422_v9, %v1899_v14  ;;  %v2608_v17 = vpop.f32.mrb[35].mxu1  ;;  %v1903_v19 = vadd.f32 %v1897_v11, %v3408_v5 }
 0x6b3   : > { %v1907_v20 = vsel %vm751_vm2, %v1903_v19, 0.0  ;;  %v1904_v22 = vadd.f32 %v1900_v15, %v3410_v6 }
 0x6b4   : > { %1908 = vadd.xlane.f32.xlu0 %v1907_v20 }
 0x6b5   : > { %v1910_v21 = vsel %vm751_vm2, %v1904_v22, 0.0 }
 0x6b6   : > { %1911 = vadd.xlane.f32.xlu1 %v1910_v21 }
 0x741   : > { %v1909_v23 = vpop.xlane.xlu0 %1908 }
 0x742   : > { %v1914_v24 = vmul.f32 0.03125, %v1909_v23 }
 0x743   : > { %v1912_v25 = vpop.xlane.xlu1 %1911 }
 0x744   : > { %v1916_v26 = vsub.f32 %v1903_v19, %v1914_v24  ;;  %v1915_v27 = vmul.f32 0.03125, %v1912_v25 }
 0x746   : > { %v1917_v28 = vsub.f32 %v1904_v22, %v1915_v27  ;;  %v1918_v29 = vmul.f32 %v1916_v26, %v1916_v26 }
 0x748   : > { %v1920_v5 = vsel %vm751_vm2, %v1918_v29, 0.0  ;;  %v1919_v30 = vmul.f32 %v1917_v28, %v1917_v28 }
 0x749   : > { %1921 = vadd.xlane.f32.xlu0 %v1920_v5  ;;  %v2438_v5 = vld [vmem:[%s710_s29] ss:$0 sm:$0xff] }
 0x74a   : > { %v1923_v6 = vsel %vm751_vm2, %v1919_v30, 0.0 }
 0x74d   : > { %1924 = vadd.xlane.f32.xlu0 %v1923_v6 }
 0x7d6   : > { %v1922_v34 = vpop.xlane.xlu0 %1921 }
 0x7d7   : > { %v1926_v35 = vmul.f32 0.03125, %v1922_v34 }
 0x7d9   : > { %v1928_v36 = vadd.f32 1e-05, %v1926_v35 }
 0x7da   : > { %v1925_v37 = vpop.xlane.xlu0 %1924 }
 0x7db   : > { %2778 = vrsqrt.f32 %v1928_v36  ;;  %v1927_v38 = vmul.f32 0.03125, %v1925_v37 }
 0x7dd   : > { %v1929_v39 = vadd.f32 1e-05, %v1927_v38 }
 0x7df   : > { %2780 = vrsqrt.f32 %v1929_v39 }
 0x7e5   : > { %v2779_v40 = vpop.eup %2778 }
 0x7e6   : > { %v1932_v41 = vmul.f32 %v2779_v40, %v1916_v26 }
 0x7e8   : > { %v1940_v43 = vmul.f32 %v2426_v42, %v1932_v41 }
 0x7e9   : > { %v2781_v16 = vpop.eup %2780 }
 0x7ea   : > { %v1933_v44 = vmul.f32 %v2781_v16, %v1917_v28  ;;  %v1948_v47 = vadd.f32 %v2427_v45, %v1940_v43 }
 0x7ec   : > { %v1941_v46 = vmul.f32 %v2426_v42, %v1933_v44 }
 0x7ee   : > { %v1949_v48 = vadd.f32 %v2427_v45, %v1941_v46 }
 0x7f0   : > { %v1950_v49 = vpack.c.bf16 %v1949_v48, %v1948_v47 }
 0x7f2   : > { %2614 = vmatmul.mubr.msk.bf16.vlgmr.msra.gmra.mrb[36].mxu0 %vm751_vm2, %v1950_v49 }
 0x8c5   : > { %v2011_v53 = vpop.f32.mrb[36].mxu0 }
 0x8c6   : > { %v2012_v54 = vadd.f32 %v2428_v52, %v2011_v53  ;;  %v2615_v55 = vpop.f32.mrb[37].mxu0 }
 0x8c7   : > { %v2014_v56 = vpop.f32.mrb[38].mxu0 }
 0x8c8   : > { %v2015_v57 = vadd.f32 %v2428_v52, %v2014_v56  ;;  %v2616_v13 = vpop.f32.mrb[39].mxu0  ;;  %v2018_v58 = vmax.f32 %v2012_v54, 0.0 }
 0x8ca   : > { %v2019_v60 = vmax.f32 %v2015_v57, 0.0 }
 0x8cc   : > { %v2020_v59 = vpack.c.bf16 %v2019_v60, %v2018_v58 }
 0x8ce   : > { %2626 = vmatmul.mubr.msk.bf16.vlgmr.msra.gmra.mrb[36].mxu1 %vm2060_vm13, %v2020_v59 }
 0x9a1   : > { %v2098_v61 = vpop.f32.mrb[36].mxu1 }
 0x9a2   : > { %v2099_v62 = vadd.f32 %v2432_v3, %v2098_v61  ;;  %v2627_v63 = vpop.f32.mrb[37].mxu1 }
 0x9a3   : > { %v2101_v0 = vpop.f32.mrb[38].mxu1 }
 0x9a4   : > { %v2102_v1 = vadd.f32 %v2432_v3, %v2101_v0  ;;  %v2628_v2 = vpop.f32.mrb[39].mxu1  ;;  %v2105_v4 = vadd.f32 %v2099_v62, %v1948_v47 }
 0x9a6   : > { %v2109_v7 = vsel %vm751_vm2, %v2105_v4, 0.0  ;;  %v2106_v8 = vadd.f32 %v2102_v1, %v1949_v48 }
 0x9a7   : > { %2110 = vadd.xlane.f32.xlu1 %v2109_v7 }
 0x9a8   : > { %v2112_v9 = vsel %vm751_vm2, %v2106_v8, 0.0 }
 0x9a9   : > { %2113 = vadd.xlane.f32.xlu0 %v2112_v9 }
 0xa34   : > { %v2111_v10 = vpop.xlane.xlu1 %2110 }
 0xa35   : > { %v2115_v11 = vmul.f32 0.03125, %v2111_v10 }
 0xa36   : > { %v2114_v12 = vpop.xlane.xlu0 %2113 }
 0xa37   : > { %v2117_v14 = vsub.f32 %v2105_v4, %v2115_v11  ;;  %v2116_v15 = vmul.f32 0.03125, %v2114_v12 }
 0xa39   : > { %v2118_v17 = vsub.f32 %v2106_v8, %v2116_v15  ;;  %v2119_v19 = vmul.f32 %v2117_v14, %v2117_v14 }
 0xa3b   : > { %v2121_v20 = vsel %vm751_vm2, %v2119_v19, 0.0  ;;  %v2120_v22 = vmul.f32 %v2118_v17, %v2118_v17 }
 0xa3c   : > { %2122 = vadd.xlane.f32.xlu1 %v2121_v20 }
 0xa3d   : > { %v2124_v21 = vsel %vm751_vm2, %v2120_v22, 0.0 }
 0xa3e   : > { %2125 = vadd.xlane.f32.xlu0 %v2124_v21 }
 0xac9   : > { %v2123_v23 = vpop.xlane.xlu1 %2122 }
 0xaca   : > { %v2127_v24 = vmul.f32 0.03125, %v2123_v23 }
 0xacb   : > { %v2126_v25 = vpop.xlane.xlu0 %2125 }
 0xacc   : > { %v2129_v26 = vadd.f32 1e-05, %v2127_v24  ;;  %v2128_v27 = vmul.f32 0.03125, %v2126_v25 }
 0xace   : > { %2782 = vrsqrt.f32 %v2129_v26  ;;  %v2130_v28 = vadd.f32 1e-05, %v2128_v27 }
 0xad0   : > { %2784 = vrsqrt.f32 %v2130_v28 }
 0xad8   : > { %v2783_v29 = vpop.eup %2782 }
 0xad9   : > { %v2133_v30 = vmul.f32 %v2783_v29, %v2117_v14 }
 0xada   : > { %v2785_v6 = vpop.eup %2784 }
 0xadb   : > { %v2141_v31 = vmul.f32 %v2438_v5, %v2133_v30  ;;  %v2134_v32 = vmul.f32 %v2785_v6, %v2118_v17  ;;  %2156 = sbr.rel (%p2440_p9) target bundleno = 2786 (0xae2), region = 100 }
 0xadd   : > { %v2149_v33 = vadd.f32 %v2439_v18, %v2141_v31  ;;  %v2142_v34 = vmul.f32 %v2438_v5, %v2134_v32 }
 0xadf   : > { %2151 = vst.msk [vmem:[#allocation2] sm:$0xff] %vm751_vm2, %v2149_v33  ;;  %v2150_v35 = vadd.f32 %v2439_v18, %v2142_v34  ;;  %2157 = vst.msk [vmem:[#allocation16] sm:$0xff] (!%p2440_p9), %vm751_vm2, %v2149_v33 }
 0xae1   : > { %2152 = vst.msk [vmem:[#allocation2 + $0x8] sm:$0xff] %vm751_vm2, %v2150_v35  ;;  %2158 = vst.msk [vmem:[#allocation16 + $0x8] sm:$0xff] (!%p2440_p9), %vm751_vm2, %v2150_v35 }
 0xae2 PF: > { %p2665_p12 = scmp.eq.s32.totalorder %s3244_s4, 1  ;;  %s3047_s30 = smov [#allocation16]  }
 0xae3   : > { %s2168_s29 = sshll.u32 %s3047_s30, 4  ;;  %s2169_s29 = int_to_ptr.vmem [resolvable:$true] %s2168_s29 }
 0xae4   : > { %s2934_s18 = scalar_lea.vmem %s2169_s29, 256  ;;  %p2941_p6 = scmp.lt.s32.totalorder %s2169_s29, %s2169_s29 }
 0xae5   : > { %p2935_p13 = scmp.ne.s32.totalorder %s2169_s29, %s2934_s18  ;;  %p2942_p0 = scmp.lt.s32.totalorder %s2934_s18, %s2934_s18 }
 0xae7   : > { %p2936_p8 = pnand %p2935_p13, %p2665_p12  ;;  %p2943_p1 = por %p2942_p0, %p2941_p6 }
 0xae9   : > { %p2937_p2 = pneg %p2936_p8 }
 0xaeb   : > { %p2944_p7 = pnand %p2943_p1, %p2937_p2 }
 0xaed   : > { %2947 = shalt.err (!%p2944_p7)
}
 0xaee   : > { %s3803_s19 = sld [smem:[#allocation36_spill]] }
 0xaf4   : > { %s2948_s22 = scalar_lea.hbm %s3803_s19, 256 }
 0xaf5   : > { %p2949_p10 = scmp.ne.s32.totalorder %s3803_s19, %s2948_s22  ;;  %p2954_p3 = scmp.lt.u32.totalorder %s2948_s22, %s3803_s19 }
 0xaf7   : > { %p2950_p11 = pnand %p2949_p10, %p2665_p12 }
 0xaf9   : > { %p2951_p5 = pneg %p2950_p11 }
 0xafb   : > { %p2956_p4 = pnand %p2954_p3, %p2951_p5 }
 0xafd   : > { %2959 = shalt.err (!%p2956_p4)
}
 0xafe   : > { %s3048_s14 = smov 128  }
 0xaff   : > { %2642 = dma.vmem_to_hbm [thread:$0]  (%p2665_p12), %s2169_s29, 256, %s3803_s19, [#allocation9], %s3048_s14, %s3048_s14, %s3044_s27  }
 0xb00   : > { %2997 = dma.done.wait (%p2665_p12), [#allocation9], 256  }
 0xb01   : > { %2999 = vsyncadd (%p2665_p12), [#allocation9], 4294967040 }
 0xb02 PF: > { %s3804_s25 = sld [smem:[#allocation23_spill]]  ;;  %s3805_s1 = sld [smem:[#allocation21_spill]] }
 0xb03   : > { %s3806_s27 = sld [smem:[#allocation25_spill]]  ;;  %s3807_s28 = sld [smem:[#allocation22_spill]] }
 0xb04   : > { %s3808_s29 = sld [smem:[#allocation24_spill]] }
 0xb08   : > { %s31_s30 = sadd.s32 1, %s3804_s25   ;;  %s3809_s25 = smov %s3006_s26 }
 0xb09   : > { %p28_p9 = scmp.ge.s32.totalorder %s31_s30, 4   ;;  %s3810_s26 = smov %s3805_s1 }
 0xb0b   :  { %30 = sbr.rel (!%p28_p9) target bundleno = 20 (0x14), region = 204 }
 0xb12   :  { %2184 = vsyncpa [#allocation8], 1 }
 0xb13   :  { %2186 = vsyncpa [#allocation8 + $0x1], 1 }
 0xb14   :  { %2187 = vsyncpa [#allocation11], 1 }
 0xb15   :  { %2189 = vsyncpa [#allocation11 + $0x1], 1 }
 0xb16   :  { %2190 = vsyncpa [#allocation14], 1 }
 0xb17   :  { %2192 = vsyncpa [#allocation14 + $0x1], 1 }
 0xb18   :  { %2193 = vsyncpa [#allocation9], 1 }
 0xb19   :  { %2195 = vsyncpa [#allocation9 + $0x1], 1 }

</bundles_post_ra>
